<compile_context>
chip_gen: v7x
topology: tpu7x:2x2x1
jax: 0.10.0
libtpu: 0.0.40
codegen_flags: <defaults>
</compile_context>

<pallas_src>
import functools

import jax
import jax.numpy as jnp
from jax.experimental import pallas as pl
from jax.experimental.pallas import tpu as pltpu


def _round_up(x, m):
    return (x + m - 1) // m * m


def _mlp_kernel(x_ref, w1_ref, b1_ref, w2_ref, b2_ref, w3_ref, b3_ref, o_ref):
    # Layer 1: Linear(in -> hidden) + ReLU. bf16 operands, f32 accumulate.
    h = jnp.dot(x_ref[...], w1_ref[...], preferred_element_type=jnp.float32)
    h = jnp.maximum(h + b1_ref[...], 0.0)           # f32 bias + ReLU (VPU)
    # Layer 2: Linear(hidden -> hidden) + ReLU.
    h = jnp.dot(h.astype(jnp.bfloat16), w2_ref[...],
                preferred_element_type=jnp.float32)
    h = jnp.maximum(h + b2_ref[...], 0.0)
    # Layer 3: Linear(hidden -> vocab), no activation.
    out = jnp.dot(h.astype(jnp.bfloat16), w3_ref[...],
                  preferred_element_type=jnp.float32)
    o_ref[...] = (out + b3_ref[...]).astype(o_ref.dtype)


@functools.partial(jax.jit, static_argnames=("block_m",))
def _eeg_to_word_call(x_bf16, w1, b1, w2, b2, w3, b3, *, block_m):
    """x_bf16: (Mp, D_in) bf16 with Mp % block_m == 0.  Returns (Mp, V) f32."""
    Mp, D_in = x_bf16.shape
    H = w1.shape[1]
    V = w3.shape[1]
    grid = (Mp // block_m,)

    flops = 2 * Mp * (D_in * H + H * H + H * V)
    bytes_accessed = (
        x_bf16.size * 2                                   # bf16 input
        + (w1.size + w2.size + w3.size) * 2               # bf16 weights
        + (b1.size + b2.size + b3.size) * 4               # f32 biases
        + Mp * V * 4                                      # f32 output
    )

    # Scoped-VMEM budget: resident weights (double-buffered BlockSpec slots)
    # + double-buffered x/out tiles + f32 activation temporaries + slack.
    weight_bytes = 2 * 2 * (w1.size + w2.size + w3.size)           # bf16, 2 bufs
    tile_bytes = 2 * (block_m * D_in * 2 + block_m * V * 4)        # x + out, 2 bufs
    act_bytes = 2 * block_m * H * 4                                # f32 temporaries
    vmem_limit = weight_bytes + tile_bytes + act_bytes + (8 << 20)
    vmem_limit = max(32 << 20, min(vmem_limit, 64 << 20))          # fits v7x physical

    return pl.pallas_call(
        _mlp_kernel,
        out_shape=jax.ShapeDtypeStruct((Mp, V), jnp.float32),
        grid_spec=pltpu.PrefetchScalarGridSpec(
            num_scalar_prefetch=0,
            grid=grid,
            in_specs=[
                pl.BlockSpec((block_m, D_in), lambda i: (i, 0)),  # x tile
                pl.BlockSpec((D_in, H), lambda i: (0, 0)),        # w1 (resident)
                pl.BlockSpec((1, H), lambda i: (0, 0)),           # b1
                pl.BlockSpec((H, H), lambda i: (0, 0)),           # w2
                pl.BlockSpec((1, H), lambda i: (0, 0)),           # b2
                pl.BlockSpec((H, V), lambda i: (0, 0)),           # w3
                pl.BlockSpec((1, V), lambda i: (0, 0)),           # b3
            ],
            out_specs=pl.BlockSpec((block_m, V), lambda i: (i, 0)),
        ),
        compiler_params=pltpu.CompilerParams(
            dimension_semantics=("parallel",),   # shard batch tiles across TCs (v7x)
            vmem_limit_bytes=vmem_limit,
        ),
        cost_estimate=pl.CostEstimate(
            flops=flops, transcendentals=0, bytes_accessed=bytes_accessed),
    )(x_bf16, w1, b1, w2, b2, w3, b3)


def eeg_to_word_forward(x, w1, b1, w2, b2, w3, b3, block_m=None):
    """Fused forward pass of EEGToWord.

    x : (M, D_in) float32
    w1: (D_in, H) f32   b1: (1, H) f32
    w2: (H, H)    f32   b2: (1, H) f32
    w3: (H, V)    f32   b3: (1, V) f32
    returns (M, V) float32
    """
    M, _ = x.shape
    if block_m is None:
        # Large batch tile (up to 256) for MXU row utilization; the cap keeps
        # the f32 hidden activation (block_m x H) within the VMEM budget.
        # Multiple of 16 so bf16 sublane packing is clean.
        block_m = min(256, _round_up(M, 16))
    block_m = _round_up(block_m, 16)

    # Pad the batch to a tile multiple instead of forcing callers to pad.
    Mp = _round_up(M, block_m)
    x_b = x.astype(jnp.bfloat16)
    if Mp != M:
        x_b = jnp.pad(x_b, ((0, Mp - M), (0, 0)))

    out = _eeg_to_word_call(
        x_b,
        w1.astype(jnp.bfloat16), b1.astype(jnp.float32),
        w2.astype(jnp.bfloat16), b2.astype(jnp.float32),
        w3.astype(jnp.bfloat16), b3.astype(jnp.float32),
        block_m=block_m,
    )
    return out[:M] if Mp != M else out


def _init_linear(key, fan_in, fan_out):
    """Deterministic init matching nn.Linear's uniform(-1/sqrt(fan_in), ...)."""
    kw, kb = jax.random.split(key)
    bound = 1.0 / jnp.sqrt(fan_in)
    # Stored as (fan_in, fan_out) so the kernel does x @ W directly.
    w = jax.random.uniform(kw, (fan_in, fan_out), jnp.float32, -bound, bound)
    b = jax.random.uniform(kb, (1, fan_out), jnp.float32, -bound, bound)
    return w, b


if __name__ == "__main__":
    # Small shapes consistent with the module (input_dim -> hidden -> hidden
    # -> vocab).  batch=400 is deliberately NOT tile-aligned to exercise the
    # padding path and still yields 2 grid steps (block_m=256) so the
    # "parallel" axis can shard across both TensorCores on v7x.
    batch = 400
    input_dim = 128
    hidden_dim = 256
    vocab_size = 128

    key = jax.random.PRNGKey(0)
    kx, k1, k2, k3 = jax.random.split(key, 4)

    x = jax.random.normal(kx, (batch, input_dim), jnp.float32)
    w1, b1 = _init_linear(k1, input_dim, hidden_dim)
    w2, b2 = _init_linear(k2, hidden_dim, hidden_dim)
    w3, b3 = _init_linear(k3, hidden_dim, vocab_size)

    out = eeg_to_word_forward(x, w1, b1, w2, b2, w3, b3)
    out = jax.block_until_ready(out)

    # Reference in plain JAX (same math as the PyTorch module).  Tolerance is
    # loosened because the kernel feeds the MXU bf16 operands (f32 accumulate).
    h = jnp.maximum(x @ w1 + b1, 0.0)
    h = jnp.maximum(h @ w2 + b2, 0.0)
    ref = h @ w3 + b3

    assert out.shape == (batch, vocab_size)
    assert jnp.allclose(out, ref, atol=5e-2, rtol=5e-2), float(
        jnp.max(jnp.abs(out - ref)))

    print("KERNEL_OK")
</pallas_src>

<mosaic_0001>
module attributes {stable_mosaic.version = 11 : i64} {
  func.func @_mlp_kernel(%arg0: i32, %arg1: memref<256x128xbf16, #tpu.memory_space<vmem>>, %arg2: memref<128x256xbf16, #tpu.memory_space<vmem>>, %arg3: memref<1x256xf32, #tpu.memory_space<vmem>>, %arg4: memref<256x256xbf16, #tpu.memory_space<vmem>>, %arg5: memref<1x256xf32, #tpu.memory_space<vmem>>, %arg6: memref<256x128xbf16, #tpu.memory_space<vmem>>, %arg7: memref<1x128xf32, #tpu.memory_space<vmem>>, %arg8: memref<256x128xf32, #tpu.memory_space<vmem>>) attributes {dimension_semantics = [#tpu.dimension_semantics<parallel>], iteration_bounds = array<i64: 2>, scalar_prefetch = 0 : i64, scratch_operands = 0 : i64, tpu.core_type = #tpu.core_type<tc>, window_params = [{transform_indices = @transform_0, window_bounds = array<i64: 256, 128>}, {pipeline_mode = #tpu.pipeline_mode<synchronous>, transform_indices = @transform_1, window_bounds = array<i64: 128, 256>}, {pipeline_mode = #tpu.pipeline_mode<synchronous>, transform_indices = @transform_2, window_bounds = array<i64: 1, 256>}, {pipeline_mode = #tpu.pipeline_mode<synchronous>, transform_indices = @transform_3, window_bounds = array<i64: 256, 256>}, {pipeline_mode = #tpu.pipeline_mode<synchronous>, transform_indices = @transform_4, window_bounds = array<i64: 1, 256>}, {pipeline_mode = #tpu.pipeline_mode<synchronous>, transform_indices = @transform_5, window_bounds = array<i64: 256, 128>}, {pipeline_mode = #tpu.pipeline_mode<synchronous>, transform_indices = @transform_6, window_bounds = array<i64: 1, 128>}, {transform_indices = @transform_7, window_bounds = array<i64: 256, 128>}]} {
    %c0 = arith.constant 0 : index
    %c0_0 = arith.constant 0 : index
    %0 = vector.load %arg1[%c0, %c0_0] : memref<256x128xbf16, #tpu.memory_space<vmem>>, vector<256x128xbf16>
    %c0_1 = arith.constant 0 : index
    %c0_2 = arith.constant 0 : index
    %1 = vector.load %arg2[%c0_1, %c0_2] : memref<128x256xbf16, #tpu.memory_space<vmem>>, vector<128x256xbf16>
    %cst = arith.constant dense<0.000000e+00> : vector<256x256xf32>
    %2 = tpu.matmul %0, %1, %cst {dimension_numbers = #tpu.dot_dimension_numbers<[1], [0], [0], [1], [0, 0, 1, 1], [], []>} : vector<256x128xbf16>, vector<128x256xbf16>, vector<256x256xf32> -> vector<256x256xf32>
    %c0_3 = arith.constant 0 : index
    %c0_4 = arith.constant 0 : index
    %3 = vector.load %arg3[%c0_3, %c0_4] : memref<1x256xf32, #tpu.memory_space<vmem>>, vector<1x256xf32>
    %4 = vector.broadcast %3 : vector<1x256xf32> to vector<256x256xf32>
    %5 = arith.addf %2, %4 : vector<256x256xf32>
    %cst_5 = arith.constant 0.000000e+00 : f32
    %6 = vector.broadcast %cst_5 : f32 to vector<256x256xf32>
    %7 = arith.maximumf %5, %6 : vector<256x256xf32>
    %8 = arith.truncf %7 : vector<256x256xf32> to vector<256x256xbf16>
    %c0_6 = arith.constant 0 : index
    %c0_7 = arith.constant 0 : index
    %9 = vector.load %arg4[%c0_6, %c0_7] : memref<256x256xbf16, #tpu.memory_space<vmem>>, vector<256x256xbf16>
    %cst_8 = arith.constant dense<0.000000e+00> : vector<256x256xf32>
    %10 = tpu.matmul %8, %9, %cst_8 {dimension_numbers = #tpu.dot_dimension_numbers<[1], [0], [0], [1], [0, 0, 1, 1], [], []>} : vector<256x256xbf16>, vector<256x256xbf16>, vector<256x256xf32> -> vector<256x256xf32>
    %c0_9 = arith.constant 0 : index
    %c0_10 = arith.constant 0 : index
    %11 = vector.load %arg5[%c0_9, %c0_10] : memref<1x256xf32, #tpu.memory_space<vmem>>, vector<1x256xf32>
    %12 = vector.broadcast %11 : vector<1x256xf32> to vector<256x256xf32>
    %13 = arith.addf %10, %12 : vector<256x256xf32>
    %cst_11 = arith.constant 0.000000e+00 : f32
    %14 = vector.broadcast %cst_11 : f32 to vector<256x256xf32>
    %15 = arith.maximumf %13, %14 : vector<256x256xf32>
    %16 = arith.truncf %15 : vector<256x256xf32> to vector<256x256xbf16>
    %c0_12 = arith.constant 0 : index
    %c0_13 = arith.constant 0 : index
    %17 = vector.load %arg6[%c0_12, %c0_13] : memref<256x128xbf16, #tpu.memory_space<vmem>>, vector<256x128xbf16>
    %cst_14 = arith.constant dense<0.000000e+00> : vector<256x128xf32>
    %18 = tpu.matmul %16, %17, %cst_14 {dimension_numbers = #tpu.dot_dimension_numbers<[1], [0], [0], [1], [0, 0, 1, 1], [], []>} : vector<256x256xbf16>, vector<256x128xbf16>, vector<256x128xf32> -> vector<256x128xf32>
    %c0_15 = arith.constant 0 : index
    %c0_16 = arith.constant 0 : index
    %19 = vector.load %arg7[%c0_15, %c0_16] : memref<1x128xf32, #tpu.memory_space<vmem>>, vector<1x128xf32>
    %20 = vector.broadcast %19 : vector<1x128xf32> to vector<256x128xf32>
    %21 = arith.addf %18, %20 : vector<256x128xf32>
    %c0_17 = arith.constant 0 : index
    %c0_18 = arith.constant 0 : index
    %22 = vector.load %arg8[%c0_17, %c0_18] : memref<256x128xf32, #tpu.memory_space<vmem>>, vector<256x128xf32>
    tpu.vector_store %arg8[%c0_17, %c0_18], %21 {strides = array<i32>} : memref<256x128xf32, #tpu.memory_space<vmem>>, vector<256x128xf32>,
    return
  }
  func.func @transform_0(%arg0: i32) -> (i32, i32) {
    %c0_i32 = arith.constant 0 : i32
    %c0_i32_0 = arith.constant 0 : i32
    return %arg0, %c0_i32 : i32, i32
  }
  func.func @transform_1(%arg0: i32) -> (i32, i32) {
    %c0_i32 = arith.constant 0 : i32
    %c0_i32_0 = arith.constant 0 : i32
    %c0_i32_1 = arith.constant 0 : i32
    return %c0_i32, %c0_i32_0 : i32, i32
  }
  func.func @transform_2(%arg0: i32) -> (i32, i32) {
    %c0_i32 = arith.constant 0 : i32
    %c0_i32_0 = arith.constant 0 : i32
    %c0_i32_1 = arith.constant 0 : i32
    return %c0_i32, %c0_i32_0 : i32, i32
  }
  func.func @transform_3(%arg0: i32) -> (i32, i32) {
    %c0_i32 = arith.constant 0 : i32
    %c0_i32_0 = arith.constant 0 : i32
    %c0_i32_1 = arith.constant 0 : i32
    return %c0_i32, %c0_i32_0 : i32, i32
  }
  func.func @transform_4(%arg0: i32) -> (i32, i32) {
    %c0_i32 = arith.constant 0 : i32
    %c0_i32_0 = arith.constant 0 : i32
    %c0_i32_1 = arith.constant 0 : i32
    return %c0_i32, %c0_i32_0 : i32, i32
  }
  func.func @transform_5(%arg0: i32) -> (i32, i32) {
    %c0_i32 = arith.constant 0 : i32
    %c0_i32_0 = arith.constant 0 : i32
    %c0_i32_1 = arith.constant 0 : i32
    return %c0_i32, %c0_i32_0 : i32, i32
  }
  func.func @transform_6(%arg0: i32) -> (i32, i32) {
    %c0_i32 = arith.constant 0 : i32
    %c0_i32_0 = arith.constant 0 : i32
    %c0_i32_1 = arith.constant 0 : i32
    return %c0_i32, %c0_i32_0 : i32, i32
  }
  func.func @transform_7(%arg0: i32) -> (i32, i32) {
    %c0_i32 = arith.constant 0 : i32
    %c0_i32_0 = arith.constant 0 : i32
    return %arg0, %c0_i32 : i32, i32
  }
}

</mosaic_0001>

<bundles_post_ra>
// kernel: _eeg_to_word_call.1
= control target key start
LH: loop header
LB: loop body
LE: loop exit
PB: predicated region body
PF: predicated region fallthrough
CT: control target
= control target key end

     0   :  { %12 = vsyncpa [#allocation3], 0  ;;  %s3029_s0 = inlined_call_operand.hbm [shape: bf16[512,128], index: 0, kind: input, shape index: {}]   ;;  %s3030_s1 = inlined_call_operand.hbm [shape: bf16[128,256], index: 1, kind: input, shape index: {}]   ;;  %s3031_s2 = inlined_call_operand.vmem [shape: f32[1,256], index: 2, kind: input, shape index: {}]   ;;  %s3032_s3 = inlined_call_operand.hbm [shape: bf16[256,256], index: 3, kind: input, shape index: {}]   ;;  %s3033_s4 = inlined_call_operand.vmem [shape: f32[1,256], index: 4, kind: input, shape index: {}]   ;;  %s3034_s5 = inlined_call_operand.hbm [shape: bf16[256,128], index: 5, kind: input, shape index: {}]   ;;  %s3035_s6 = inlined_call_operand.vmem [shape: f32[1,128], index: 6, kind: input, shape index: {}]   ;;  %s3036_s7 = inlined_call_operand.hbm [shape: f32[512,128], index: 7, kind: output, shape index: {}]  }
   0x1   :  { %14 = vsyncpa [#allocation3 + $0x1], 0 }
   0x2   :  { %15 = vsyncpa [#allocation6], 0 }
   0x3   :  { %16 = vsyncpa [#allocation9], 0 }
   0x4   :  { %17 = vsyncpa [#allocation4], 0 }
   0x5   :  { %19 = vsyncpa [#allocation4 + $0x1], 0  ;;  %s2467_s24 = smov 0   ;;  %s2469_s25 = smov 0  }
   0x6   :  { %s2471_s26 = smov 0   ;;  %s2473_s27 = smov 0  }
   0x7 LB: > { %s2488_s28 = sadd.s32 4294967295, %s2413_s27   ;;  %s1806_s29 = sadd.s32 4294967294, %s2413_s27   ;;  %s2413_s27 = sphi %s2473_s27, %s3062_s27   ;;  %s2409_s26 = sphi %s2471_s26, %s3061_s26   ;;  %s2405_s25 = sphi %s2469_s25, %s3060_s25   ;;  %s2401_s24 = sphi %s2467_s24, %s3059_s24  }
   0x8   : > { %p45_p0 = scmp.ne.s32.totalorder %s2405_s25, %s2401_s24  ;;  %p3037_p1 = scmp.eq.s32.totalorder %s2488_s28, 0 }
   0x9   : > { %p201_p3 = scmp.eq.s32.totalorder %s1806_s29, 1  ;;  %p1807_p5 = scmp.ge.s32.totalorder %s2413_s27, 1 }
   0xa   : > { %p2497_p4 = por %p3037_p1, %p45_p0  ;;  %p208_p7 = scmp.lt.s32.totalorder %s2413_s27, 3 }
   0xb   : > { %p2502_p6 = por %p201_p3, %p45_p0  ;;  %s2415_s10 = smov [#allocation5]  }
   0xc   : > { %s3041_s30 = scalar_select %p2497_p4, 1, 0 }
   0xd   : > { %s3042_s8 = scalar_select %p2502_p6, 1, 0 }
   0xe   : > { %p2507_p8 = pnand %p1807_p5, %p208_p7  ;;  %s220_s11 = sshll.u32 %s2415_s10, 4  ;;  %s2511_s11 = int_to_ptr.vmem [resolvable:$true] %s220_s11 }
   0xf   : > { %3043 = sst [smem:[#allocation15_spill]] %s3042_s8  ;;  %s2416_s13 = smov [#allocation7]  }
  0x10   : > { %s3044_s9 = scalar_select %p2507_p8, 1, 0 }
  0x11   : > { %p2053_p9 = pneg %p2507_p8  ;;  %s236_s14 = sshll.u32 %s2416_s13, 4  ;;  %s2522_s14 = int_to_ptr.vmem [resolvable:$true] %s236_s14 }
  0x12   : > { %s2417_s15 = smov [#allocation8]   ;;  %s2225_s19 = scalar_lea.hbm %s3030_s1, 2048 }
  0x13   : > { %p2518_p11 = pnand %p2053_p9, %p3037_p1  ;;  %s2524_s16 = sshll.u32 %s2417_s15, 4  ;;  %s253_s16 = int_to_ptr.vmem [resolvable:$true] %s2524_s16 }
  0x14   : > { %p2226_p12 = scmp.ne.s32.totalorder %s3030_s1, %s2225_s19  ;;  %p2232_p5 = scmp.lt.u32.totalorder %s2225_s19, %s3030_s1 }
  0x15   : > { %p2534_p13 = pneg %p2518_p11 }
  0x17   : > { %p2228_p0 = pnand %p2534_p13, %p2226_p12 }
  0x19   : > { %p2229_p3 = pneg %p2228_p0 }
  0x1b   : > { %p2234_p7 = pnand %p2232_p5, %p2229_p3 }
  0x1d   : > { %2237 = shalt.err (!%p2234_p7)
}
  0x1e   : > { %s2238_s10 = scalar_lea.vmem %s2511_s11, 2048  ;;  %p2246_p2 = scmp.lt.s32.totalorder %s2511_s11, %s2511_s11 }
  0x1f   : > { %p2239_p9 = scmp.ne.s32.totalorder %s2511_s11, %s2238_s10  ;;  %p2247_p6 = scmp.lt.s32.totalorder %s2238_s10, %s2238_s10 }
  0x21   : > { %p2241_p10 = pnand %p2239_p9, %p2534_p13  ;;  %p2248_p12 = por %p2247_p6, %p2246_p2 }
  0x23   : > { %p2242_p1 = pneg %p2241_p10 }
  0x25   : > { %p2249_p0 = pnand %p2248_p12, %p2242_p1 }
  0x27   : > { %2252 = shalt.err (!%p2249_p0)
}
  0x28   : > { %s2418_s13 = smov 128   ;;  %s2419_s15 = smov 8  }
  0x29   : > { %2056 = dma.hbm_to_vmem [thread:$0]  (!%p2518_p11), %s3030_s1, 2048, %s2511_s11, [#allocation6], %s2418_s13, %s2418_s13, %s2419_s15  }
  0x2a   : > { %s2253_s21 = scalar_lea.hbm %s3032_s3, 4096 }
  0x2b   : > { %p2254_p2 = scmp.ne.s32.totalorder %s3032_s3, %s2253_s21  ;;  %p2260_p10 = scmp.lt.u32.totalorder %s2253_s21, %s3032_s3 }
  0x2d   : > { %p2256_p1 = pnand %p2254_p2, %p2534_p13 }
  0x2f   : > { %p2257_p6 = pneg %p2256_p1 }
  0x31   : > { %p2262_p3 = pnand %p2260_p10, %p2257_p6 }
  0x33   : > { %2265 = shalt.err (!%p2262_p3)
}
  0x34   : > { %s2266_s11 = scalar_lea.vmem %s2522_s14, 4096  ;;  %p2274_p12 = scmp.lt.s32.totalorder %s2522_s14, %s2522_s14 }
  0x35   : > { %p2267_p5 = scmp.ne.s32.totalorder %s2522_s14, %s2266_s11  ;;  %p2275_p0 = scmp.lt.s32.totalorder %s2266_s11, %s2266_s11 }
  0x37   : > { %p2269_p7 = pnand %p2267_p5, %p2534_p13  ;;  %p2276_p2 = por %p2275_p0, %p2274_p12 }
  0x39   : > { %p2270_p9 = pneg %p2269_p7 }
  0x3b   : > { %p2277_p1 = pnand %p2276_p2, %p2270_p9 }
  0x3d   : > { %2280 = shalt.err (!%p2277_p1)
}
  0x3e   : > { %2059 = dma.hbm_to_vmem [thread:$0]  (!%p2518_p11), %s3032_s3, 4096, %s2522_s14, [#allocation6], %s2418_s13, %s2418_s13, %s2419_s15  }
  0x3f   : > { %s2281_s20 = scalar_lea.hbm %s3034_s5, 2048 }
  0x40   : > { %p2282_p6 = scmp.ne.s32.totalorder %s3034_s5, %s2281_s20  ;;  %p2288_p5 = scmp.lt.u32.totalorder %s2281_s20, %s3034_s5 }
  0x42   : > { %p2284_p10 = pnand %p2282_p6, %p2534_p13 }
  0x44   : > { %p2285_p3 = pneg %p2284_p10 }
  0x46   : > { %p2290_p7 = pnand %p2288_p5, %p2285_p3 }
  0x48   : > { %2293 = shalt.err (!%p2290_p7)
}
  0x49   : > { %s2294_s11 = scalar_lea.vmem %s253_s16, 2048  ;;  %p2302_p2 = scmp.lt.s32.totalorder %s253_s16, %s253_s16 }
  0x4a   : > { %p2295_p9 = scmp.ne.s32.totalorder %s253_s16, %s2294_s11  ;;  %p2303_p1 = scmp.lt.s32.totalorder %s2294_s11, %s2294_s11 }
  0x4c   : > { %p2297_p12 = pnand %p2295_p9, %p2534_p13  ;;  %p2304_p4 = por %p2303_p1, %p2302_p2 }
  0x4e   : > { %p2298_p0 = pneg %p2297_p12 }
  0x50   : > { %p2305_p8 = pnand %p2304_p4, %p2298_p0 }
  0x52   : > { %2308 = shalt.err (!%p2305_p8)
}
  0x53   : > { %s2420_s14 = smov 64   ;;  %s2421_s22 = smov 4  }
  0x54   : > { %2062 = dma.hbm_to_vmem [thread:$0]  (!%p2518_p11), %s3034_s5, 2048, %s253_s16, [#allocation9], %s2420_s14, %s2420_s14, %s2421_s22  }
  0x55   : > { %s2601_s8 = sadd.s32 1, %s2413_s27   ;;  %s32_s18 = sadd.s32 1, %s2409_s26 }
  0x56   : > { %s29_s17 = ssub.s32 %s2413_s27, %s2601_s8  ;;  %p39_p8 = scmp.ne.s32.totalorder %s2409_s26, %s2405_s25 }
  0x57   : > { %p30_p4 = scmp.eq.s32.totalorder %s29_s17, 0  ;;  %p40_p13 = scmp.eq.s32.totalorder %s2413_s27, 0 }
  0x58   : > { %p2074_p6 = scmp.lt.s32.totalorder %s2413_s27, 2  ;;  %p3047_p3 = scmp.eq.s32.totalorder %s2488_s28, 1 }
  0x59   : > { %s2611_s19 = scalar_select %p30_p4, %s2409_s26, %s32_s18  }
  0x5a   : > { %p41_p10 = por %p40_p13, %p39_p8  ;;  %p2615_p5 = por %p3047_p3, %p39_p8 }
  0x5b   : > { %s269_s20 = sand.u32 1, %s2409_s26   ;;  %s1907_s21 = sshll.u32 %s2413_s27, 11 }
  0x5c   : > { %s1812_s16 = sshll.u32 %s269_s20, 7  ;;  %s2624_s10 = scalar_lea.hbm %s3029_s0, %s1907_s21 }
  0x5d   : > { %s273_s11 = scalar_lea.vmem [#allocation2], %s1812_s16  ;;  %p2626_p11 = pnand %p2074_p6, %p41_p10 }
  0x5e   : > { %s280_s13 = sshll.u32 %s273_s11, 4  ;;  %s2632_s17 = scalar_lea.sflag [#allocation3], %s269_s20  ;;  %s2630_s13 = int_to_ptr.vmem [resolvable:$true] %s280_s13 }
  0x5f   : > { %s2309_s18 = scalar_lea.hbm %s2624_s10, 2048  ;;  %p2311_p9 = pneg %p2626_p11 }
  0x60   : > { %p2310_p7 = scmp.ne.s32.totalorder %s2624_s10, %s2309_s18  ;;  %s2314_s23 = scalar_lea.hbm %s3029_s0, 4096 }
  0x61   : > { %p2315_p2 = scmp.lt.u32.totalorder %s2624_s10, %s3029_s0  ;;  %p2316_p1 = scmp.lt.u32.totalorder %s2314_s23, %s2309_s18 }
  0x62   : > { %p2312_p12 = pnand %p2311_p9, %p2310_p7  ;;  %p2318_p8 = scmp.lt.u32.totalorder %s2309_s18, %s2624_s10 }
  0x63   : > { %p2317_p4 = por %p2316_p1, %p2315_p2 }
  0x64   : > { %p2313_p0 = pneg %p2312_p12 }
  0x65   : > { %p2319_p13 = por %p2318_p8, %p2317_p4 }
  0x67   : > { %p2320_p6 = pnand %p2319_p13, %p2313_p0 }
  0x69   : > { %2323 = shalt.err (!%p2320_p6)
}
  0x6a   : > { %s2324_s20 = scalar_lea.vmem %s2630_s13, 2048  ;;  %s2422_s21 = smov [#allocation2]  }
  0x6b   : > { %p2325_p10 = scmp.ne.s32.totalorder %s2630_s13, %s2324_s20  ;;  %s2329_s16 = sshll.u32 %s2422_s21, 4  ;;  %s2330_s16 = int_to_ptr.vmem [resolvable:$false] %s2329_s16 }
  0x6c   : > { %s2331_s29 = scalar_lea.vmem %s2330_s16, 4096  ;;  %p2332_p12 = scmp.lt.s32.totalorder %s2630_s13, %s2330_s16 }
  0x6d   : > { %p2327_p3 = pnand %p2325_p10, %p2311_p9  ;;  %p2333_p2 = scmp.lt.s32.totalorder %s2331_s29, %s2324_s20 }
  0x6f   : > { %p2328_p7 = pneg %p2327_p3  ;;  %p2334_p1 = por %p2333_p2, %p2332_p12 }
  0x71   : > { %p2335_p4 = pnand %p2334_p1, %p2328_p7 }
  0x73   : > { %2338 = shalt.err (!%p2335_p4)
}
  0x74   : > { %2066 = dma.hbm_to_vmem [thread:$0]  (!%p2626_p11), %s2624_s10, 2048, %s2630_s13, %s2632_s17, %s2420_s14, %s2420_s14, %s2421_s22  }
  0x75   : > { %p3050_p9 = scmp.ne.s32.totalorder %s3044_s9, 0 }
  0x76   : > { %s2666_s18 = sand.u32 (!%p3050_p9), 1, %s2405_s25   ;;  %p3051_p0 = scmp.ne.s32.totalorder (!%p3050_p9), %s3041_s30, 0 }
  0x77   : > { %292 = sbr.rel (%p3050_p9) target bundleno = 966 (0x3c6), region = 48  ;;  %s1816_s23 = sshll.u32 (!%p3050_p9), %s2666_s18, 7 }
  0x78   : > { %s295_s11 = scalar_lea.sflag (!%p3050_p9), [#allocation3], %s2666_s18  ;;  %s2670_s20 = scalar_lea.vmem (!%p3050_p9), [#allocation2], %s1816_s23 }
  0x7e   : > { %2384 = dma.done.wait (%p3051_p0), %s295_s11, 2048  }
  0x7f   : > { %2386 = vsyncadd (%p3051_p0), %s295_s11, 4294965248  ;;  %p3052_p11 = scmp.eq.s32.totalorder %s2488_s28, 0 }
  0x81   : > { %2388 = dma.done.wait (%p3052_p11), [#allocation6], 6144   ;;  %p3053_p8 = pmov %p3052_p11 }
  0x83   : > { %2390 = vsyncadd (%p3053_p8), [#allocation6], 4294961152  ;;  %p3054_p13 = pmov %p3053_p8 }
  0x84   : > { %p3055_p6 = pmov %p3053_p8 }
  0x85   : > { %2392 = dma.done.wait (%p3054_p13), [#allocation9], 2048  }
  0x86   : > { %2394 = vsyncadd (%p3055_p6), [#allocation9], 4294965248  ;;  %v2423_v0 = vmov 0   ;;  %v2121_v1 = vld [vmem:[#allocation5 + $0x4] ss:$8 sps:$4 sm:$0xff]   ;;  %v2147_v28 = vld [vmem:[%s2670_s20 + $0x10] sm:$0xff]  }
  0x87   : > { %612 = vmatprep.mubr.bf16.mxu0 %v2423_v0  ;;  %692 = vmatprep.mubr.bf16.mxu1 %v2423_v0  ;;  %v2123_v2 = vld [vmem:[#allocation5] ss:$8 sps:$4 sm:$0xff]   ;;  %v2124_v3 = vld [vmem:[#allocation5 + $0x14] ss:$8 sps:$4 sm:$0xff]   ;;  %v2126_v4 = vld [vmem:[#allocation5 + $0x10] ss:$8 sps:$4 sm:$0xff]  }
  0x88   : > { %580 = vmatprep.subr.bf16.mxu0 %v2121_v1  ;;  %2021 = vmatprep.subr.bf16.mxu1 %v2121_v1  ;;  %v2127_v5 = vld [vmem:[#allocation5 + $0x24] ss:$8 sps:$4 sm:$0xff]   ;;  %v2129_v6 = vld [vmem:[#allocation5 + $0x20] ss:$8 sps:$4 sm:$0xff]   ;;  %v2130_v7 = vld [vmem:[#allocation5 + $0x34] ss:$8 sps:$4 sm:$0xff]  }
  0x89   : > { %581 = vmatpush1.bf16.msra.mxu0 %v2123_v2  ;;  %2029 = vmatpush1.bf16.msra.mxu1 %v2123_v2  ;;  %v2132_v8 = vld [vmem:[#allocation5 + $0x30] ss:$8 sps:$4 sm:$0xff]   ;;  %v2133_v9 = vld [vmem:[#allocation5 + $0x44] ss:$8 sps:$4 sm:$0xff]   ;;  %v2135_v10 = vld [vmem:[#allocation5 + $0x40] ss:$8 sps:$4 sm:$0xff]   ;;  %v394_v2 = vlaneseq }
  0x8a   : > { %582 = vmatprep.subr.bf16.mxu0 %v2124_v3  ;;  %2022 = vmatprep.subr.bf16.mxu1 %v2124_v3  ;;  %v2136_v11 = vld [vmem:[#allocation5 + $0x54] ss:$8 sps:$4 sm:$0xff]   ;;  %v2138_v12 = vld [vmem:[#allocation5 + $0x50] ss:$8 sps:$4 sm:$0xff]   ;;  %v2139_v13 = vld [vmem:[#allocation5 + $0x64] ss:$8 sps:$4 sm:$0xff]  }
  0x8b   : > { %v2141_v14 = vld [vmem:[#allocation5 + $0x60] ss:$8 sps:$4 sm:$0xff]   ;;  %v2142_v15 = vld [vmem:[#allocation5 + $0x74] ss:$8 sps:$4 sm:$0xff]   ;;  %v2144_v16 = vld [vmem:[#allocation5 + $0x70] ss:$8 sps:$4 sm:$0xff]  }
  0x8c   : > { %v2163_v17 = vld [vmem:[#allocation7 + $0x4] ss:$8 sps:$4 sm:$0xff]   ;;  %v2161_v20 = vld [vmem:[#allocation7] ss:$8 sps:$4 sm:$0xff]   ;;  %v2166_v21 = vld [vmem:[#allocation7 + $0x14] ss:$8 sps:$4 sm:$0xff]  }
  0x8d   : > { %583 = vmatpush1.bf16.msra.mxu0 %v2126_v4  ;;  %2030 = vmatpush1.bf16.msra.mxu1 %v2126_v4  ;;  %v2145_v18 = vld [vmem:[%s2670_s20] sm:$0xff]   ;;  %v2164_v22 = vld [vmem:[#allocation7 + $0x10] ss:$8 sps:$4 sm:$0xff]   ;;  %v2146_v24 = vld [vmem:[%s2670_s20 + $0x8] sm:$0xff]   ;;  %v2716_v3 = vshrl.u32 %v394_v2, 7  ;;  %s1820_s10 = sshll.u32 %s2666_s18, 8 }
  0x8e   : > { %584 = vmatprep.subr.bf16.mxu0 %v2127_v5  ;;  %2023 = vmatprep.subr.bf16.mxu1 %v2127_v5  ;;  %v2153_v19 = vld [vmem:[%s2670_s20 + $0x40] sm:$0xff]   ;;  %v2154_v25 = vld [vmem:[%s2670_s20 + $0x48] sm:$0xff]   ;;  %v2172_v27 = vld [vmem:[#allocation7 + $0x34] ss:$8 sps:$4 sm:$0xff]   ;;  %s2913_s17 = scalar_lea.vmem [#allocation10], %s1820_s10  ;;  %s1908_s21 = sshll.u32 %s2488_s28, 12 }
  0x8f   : > { %v2169_v23 = vld [vmem:[#allocation7 + $0x24] ss:$8 sps:$4 sm:$0xff]   ;;  %v2167_v26 = vld [vmem:[#allocation7 + $0x20] ss:$8 sps:$4 sm:$0xff]   ;;  %v2170_v29 = vld [vmem:[#allocation7 + $0x30] ss:$8 sps:$4 sm:$0xff]   ;;  %s2980_s11 = scalar_lea.hbm %s3036_s7, %s1908_s21 }
  0x90   : > { %v2155_v30 = vld [vmem:[%s2670_s20 + $0x50] sm:$0xff]   ;;  %v2175_v31 = vld [vmem:[#allocation7 + $0x44] ss:$8 sps:$4 sm:$0xff]   ;;  %v2173_v32 = vld [vmem:[#allocation7 + $0x40] ss:$8 sps:$4 sm:$0xff]   ;;  %v400_v5 = vsub.s32 1, %v2716_v3 }
  0x91   : > { %585 = vmatpush1.bf16.msra.mxu0 %v2129_v6  ;;  %2031 = vmatpush1.bf16.msra.mxu1 %v2129_v6  ;;  %v2178_v33 = vld [vmem:[#allocation7 + $0x54] ss:$8 sps:$4 sm:$0xff]   ;;  %v2176_v34 = vld [vmem:[#allocation7 + $0x50] ss:$8 sps:$4 sm:$0xff]   ;;  %v2181_v35 = vld [vmem:[#allocation7 + $0x64] ss:$8 sps:$4 sm:$0xff]  }
  0x92   : > { %586 = vmatprep.subr.bf16.mxu0 %v2130_v7  ;;  %2024 = vmatprep.subr.bf16.mxu1 %v2130_v7  ;;  %v2148_v36 = vld [vmem:[%s2670_s20 + $0x18] sm:$0xff]   ;;  %v2179_v38 = vld [vmem:[#allocation7 + $0x60] ss:$8 sps:$4 sm:$0xff]   ;;  %v2187_v41 = vld [vmem:[#allocation7 + $0x84] ss:$8 sps:$4 sm:$0xff]   ;;  %s1704_s16 = sshll.u32 %s2913_s17, 4  ;;  %s2982_s16 = int_to_ptr.vmem [resolvable:$true] %s1704_s16 }
  0x93   : > { %v2156_v37 = vld [vmem:[%s2670_s20 + $0x58] sm:$0xff]   ;;  %v2149_v42 = vld [vmem:[%s2670_s20 + $0x20] sm:$0xff]   ;;  %v2150_v48 = vld [vmem:[%s2670_s20 + $0x28] sm:$0xff]   ;;  %s1691_s28 = scalar_lea.sflag [#allocation4], %s2666_s18  ;;  %s2424_s30 = smov [#allocation10]  }
  0x94   : > { %v2184_v39 = vld [vmem:[#allocation7 + $0x74] ss:$8 sps:$4 sm:$0xff]   ;;  %v2182_v40 = vld [vmem:[#allocation7 + $0x70] ss:$8 sps:$4 sm:$0xff]   ;;  %v2157_v43 = vld [vmem:[%s2670_s20 + $0x60] sm:$0xff]   ;;  %s2343_s9 = sshll.u32 %s2424_s30, 4  ;;  %s2344_s9 = int_to_ptr.vmem [resolvable:$false] %s2343_s9 }
  0x95   : > { %587 = vmatpush1.bf16.msra.mxu0 %v2132_v8  ;;  %2032 = vmatpush1.bf16.msra.mxu1 %v2132_v8  ;;  %v2185_v44 = vld [vmem:[#allocation7 + $0x80] ss:$8 sps:$4 sm:$0xff]   ;;  %v2190_v45 = vld [vmem:[#allocation7 + $0x94] ss:$8 sps:$4 sm:$0xff]   ;;  %v2188_v46 = vld [vmem:[#allocation7 + $0x90] ss:$8 sps:$4 sm:$0xff]   ;;  %p2346_p12 = scmp.lt.s32.totalorder %s2982_s16, %s2344_s9 }
  0x96   : > { %588 = vmatprep.subr.bf16.mxu0 %v2133_v9  ;;  %2025 = vmatprep.subr.bf16.mxu1 %v2133_v9  ;;  %v2193_v47 = vld [vmem:[#allocation7 + $0xa4] ss:$8 sps:$4 sm:$0xff]   ;;  %v2191_v50 = vld [vmem:[#allocation7 + $0xa0] ss:$8 sps:$4 sm:$0xff]   ;;  %v2196_v51 = vld [vmem:[#allocation7 + $0xb4] ss:$8 sps:$4 sm:$0xff]  }
  0x97   : > { %v2158_v49 = vld [vmem:[%s2670_s20 + $0x68] sm:$0xff]   ;;  %v2194_v52 = vld [vmem:[#allocation7 + $0xb0] ss:$8 sps:$4 sm:$0xff]   ;;  %v2202_v57 = vld [vmem:[#allocation7 + $0xd4] ss:$8 sps:$4 sm:$0xff]   ;;  %s2345_s14 = scalar_lea.vmem %s2344_s9, 8192 }
  0x98   : > { %v2199_v53 = vld [vmem:[#allocation7 + $0xc4] ss:$8 sps:$4 sm:$0xff]   ;;  %v2151_v54 = vld [vmem:[%s2670_s20 + $0x30] sm:$0xff]   ;;  %v2197_v56 = vld [vmem:[#allocation7 + $0xc0] ss:$8 sps:$4 sm:$0xff]  }
  0x99   : > { %589 = vmatpush1.bf16.msra.mxu0 %v2135_v10  ;;  %2033 = vmatpush1.bf16.msra.mxu1 %v2135_v10  ;;  %v2159_v55 = vld [vmem:[%s2670_s20 + $0x70] sm:$0xff]   ;;  %v2152_v59 = vld [vmem:[%s2670_s20 + $0x38] sm:$0xff]   ;;  %v2205_v61 = vld [vmem:[#allocation7 + $0xe4] ss:$8 sps:$4 sm:$0xff]  }
  0x9a   : > { %590 = vmatprep.subr.bf16.mxu0 %v2136_v11  ;;  %2026 = vmatprep.subr.bf16.mxu1 %v2136_v11  ;;  %v2200_v58 = vld [vmem:[#allocation7 + $0xd0] ss:$8 sps:$4 sm:$0xff]   ;;  %v2203_v62 = vld [vmem:[#allocation7 + $0xe0] ss:$8 sps:$4 sm:$0xff]   ;;  %v2208_v63 = vld [vmem:[#allocation7 + $0xf4] ss:$8 sps:$4 sm:$0xff]  }
  0x9b   : > { %v2160_v60 = vld [vmem:[%s2670_s20 + $0x78] sm:$0xff]   ;;  %v392_v4 = vld [vmem:[%s3031_s2] sm:$0x3]  ;;  %s2339_s20 = scalar_lea.vmem %s2982_s16, 4096 }
  0x9c   : > { %v2206_v1 = vld [vmem:[#allocation7 + $0xf0] ss:$8 sps:$4 sm:$0xff]   ;;  %v2729_v7 = vrot.slane %v392_v4, %v400_v5  ;;  %p2340_p10 = scmp.ne.s32.totalorder %s2982_s16, %s2339_s20  ;;  %p2347_p2 = scmp.lt.s32.totalorder %s2345_s14, %s2339_s20 }
  0x9d   : > { %591 = vmatpush1.bf16.msra.mxu0 %v2138_v12  ;;  %2034 = vmatpush1.bf16.msra.mxu1 %v2138_v12 }
  0x9e   : > { %592 = vmatprep.subr.bf16.mxu0 %v2139_v13  ;;  %2027 = vmatprep.subr.bf16.mxu1 %v2139_v13  ;;  %p2341_p3 = pnand %p2340_p10, %p2615_p5  ;;  %p2348_p1 = por %p2347_p2, %p2346_p12 }
  0xa0   : > { %p2342_p7 = pneg %p2341_p3 }
  0xa1   : > { %593 = vmatpush1.bf16.msra.mxu0 %v2141_v14  ;;  %2035 = vmatpush1.bf16.msra.mxu1 %v2141_v14 }
  0xa2   : > { %594 = vmatprep.subr.bf16.mxu0 %v2142_v15  ;;  %2028 = vmatprep.subr.bf16.mxu1 %v2142_v15  ;;  %p2349_p4 = pnand %p2348_p1, %p2342_p7 }
  0xa5   : > { %595 = vmatpush1.bf16.msra.mxu0 %v2144_v16  ;;  %2036 = vmatpush1.bf16.msra.mxu1 %v2144_v16 }
  0xa6   : > { %1073 = vmatprep.subr.bf16.mxu1 %v2163_v17 }
  0xa8   : > { %613 = vmatmul.mubr.bf16.vlgmr.msra.gmra.mrb[0].mxu0 %v2145_v18  ;;  %693 = vmatmul.mubr.bf16.vlgmr.msra.gmra.mrb[0].mxu1 %v2153_v19 }
  0xa9   : > { %622 = vmatprep.mubr.bf16.mxu0 %v2423_v0  ;;  %702 = vmatprep.mubr.bf16.mxu1 %v2423_v0 }
  0xaa   : > { %1074 = vmatpush1.bf16.msra.mxu1 %v2161_v20 }
  0xab   : > { %1075 = vmatprep.subr.bf16.mxu1 %v2166_v21 }
  0xae   : > { %1076 = vmatpush1.bf16.msra.mxu1 %v2164_v22 }
  0xaf   : > { %1077 = vmatprep.subr.bf16.mxu1 %v2169_v23  ;;  %v2209_v23 = vld [vmem:[#allocation8 + $0x40] sm:$0xff]  }
  0xb0   : > { %623 = vmatmul.mubr.bf16.gmra.mrb[4].mxu0 %v2146_v24  ;;  %703 = vmatmul.mubr.bf16.gmra.mrb[4].mxu1 %v2154_v25  ;;  %v2210_v24 = vld [vmem:[#allocation8] sm:$0xff]  }
  0xb1   : > { %632 = vmatprep.mubr.bf16.mxu0 %v2423_v0  ;;  %712 = vmatprep.mubr.bf16.mxu1 %v2423_v0 }
  0xb2   : > { %1078 = vmatpush1.bf16.msra.mxu1 %v2167_v26  ;;  %1909 = vmatprep.subr.bf16.mxu0 %v2209_v23 }
  0xb3   : > { %1079 = vmatprep.subr.bf16.mxu1 %v2172_v27  ;;  %1910 = vmatpush3.bf16.msra.mxu0 %v2210_v24  ;;  %v2218_v24 = vld [vmem:[#allocation8 + $0x20] sm:$0xff]  }
  0xb6   : > { %1080 = vmatpush1.bf16.msra.mxu1 %v2170_v29 }
  0xb7   : > { %1081 = vmatprep.subr.bf16.mxu1 %v2175_v31 }
  0xb8   : > { %633 = vmatmul.mubr.bf16.gmra.mrb[8].mxu0 %v2147_v28  ;;  %713 = vmatmul.mubr.bf16.gmra.mrb[8].mxu1 %v2155_v30  ;;  %v2211_v28 = vld [vmem:[#allocation8 + $0x48] sm:$0xff]  }
  0xb9   : > { %642 = vmatprep.mubr.bf16.mxu0 %v2423_v0  ;;  %722 = vmatprep.mubr.bf16.mxu1 %v2423_v0 }
  0xba   : > { %1082 = vmatpush1.bf16.msra.mxu1 %v2173_v32  ;;  %1911 = vmatprep.subr.bf16.mxu0 %v2211_v28 }
  0xbb   : > { %1083 = vmatprep.subr.bf16.mxu1 %v2178_v33 }
  0xbe   : > { %1084 = vmatpush1.bf16.msra.mxu1 %v2176_v34 }
  0xbf   : > { %1085 = vmatprep.subr.bf16.mxu1 %v2181_v35  ;;  %v2212_v35 = vld [vmem:[#allocation8 + $0x8] sm:$0xff]  }
  0xc0   : > { %643 = vmatmul.mubr.bf16.gmra.mrb[12].mxu0 %v2148_v36  ;;  %723 = vmatmul.mubr.bf16.gmra.mrb[12].mxu1 %v2156_v37 }
  0xc1   : > { %652 = vmatprep.mubr.bf16.mxu0 %v2423_v0  ;;  %732 = vmatprep.mubr.bf16.mxu1 %v2423_v0 }
  0xc2   : > { %1086 = vmatpush1.bf16.msra.mxu1 %v2179_v38  ;;  %v2213_v38 = vld [vmem:[#allocation8 + $0x50] sm:$0xff]   ;;  %1912 = vmatpush3.bf16.msra.mxu0 %v2212_v35 }
  0xc3   : > { %1087 = vmatprep.subr.bf16.mxu1 %v2184_v39  ;;  %1913 = vmatprep.subr.bf16.mxu0 %v2213_v38 }
  0xc6   : > { %1088 = vmatpush1.bf16.msra.mxu1 %v2182_v40 }
  0xc7   : > { %1089 = vmatprep.subr.bf16.mxu1 %v2187_v41 }
  0xc8   : > { %653 = vmatmul.mubr.bf16.gmra.mrb[16].mxu0 %v2149_v42  ;;  %733 = vmatmul.mubr.bf16.gmra.mrb[16].mxu1 %v2157_v43 }
  0xc9   : > { %662 = vmatprep.mubr.bf16.mxu0 %v2423_v0  ;;  %742 = vmatprep.mubr.bf16.mxu1 %v2423_v0 }
  0xca   : > { %1090 = vmatpush1.bf16.msra.mxu1 %v2185_v44 }
  0xcb   : > { %1091 = vmatprep.subr.bf16.mxu1 %v2190_v45 }
  0xce   : > { %1092 = vmatpush1.bf16.msra.mxu1 %v2188_v46 }
  0xcf   : > { %1093 = vmatprep.subr.bf16.mxu1 %v2193_v47 }
  0xd0   : > { %663 = vmatmul.mubr.bf16.gmra.mrb[20].mxu0 %v2150_v48  ;;  %743 = vmatmul.mubr.bf16.gmra.mrb[20].mxu1 %v2158_v49 }
  0xd1   : > { %672 = vmatprep.mubr.bf16.mxu0 %v2423_v0  ;;  %752 = vmatprep.mubr.bf16.mxu1 %v2423_v0 }
  0xd2   : > { %1094 = vmatpush1.bf16.msra.mxu1 %v2191_v50 }
  0xd3   : > { %1095 = vmatprep.subr.bf16.mxu1 %v2196_v51  ;;  %v2214_v51 = vld [vmem:[#allocation8 + $0x10] sm:$0xff]  }
  0xd4   : > { %1914 = vmatpush3.bf16.msra.mxu0 %v2214_v51 }
  0xd6   : > { %1096 = vmatpush1.bf16.msra.mxu1 %v2194_v52 }
  0xd7   : > { %1097 = vmatprep.subr.bf16.mxu1 %v2199_v53 }
  0xd8   : > { %673 = vmatmul.mubr.bf16.gmra.mrb[24].mxu0 %v2151_v54  ;;  %753 = vmatmul.mubr.bf16.gmra.mrb[24].mxu1 %v2159_v55 }
  0xd9   : > { %682 = vmatprep.mubr.bf16.mxu0 %v2423_v0  ;;  %762 = vmatprep.mubr.bf16.mxu1 %v2423_v0  ;;  %v396_v0 = vsub.s32 0, %v2716_v3 }
  0xda   : > { %1098 = vmatpush1.bf16.msra.mxu1 %v2197_v56 }
  0xdb   : > { %1099 = vmatprep.subr.bf16.mxu1 %v2202_v57  ;;  %v2725_v6 = vrot.slane %v392_v4, %v396_v0  ;;  %v2215_v57 = vld [vmem:[#allocation8 + $0x58] sm:$0xff]  }
  0xdc   : > { %1915 = vmatprep.subr.bf16.mxu0 %v2215_v57 }
  0xde   : > { %1100 = vmatpush1.bf16.msra.mxu1 %v2200_v58 }
  0xdf   : > { %1101 = vmatprep.subr.bf16.mxu1 %v2205_v61 }
  0xe0   : > { %683 = vmatmul.mubr.bf16.gmra.mrb[28].mxu0 %v2152_v59  ;;  %763 = vmatmul.mubr.bf16.gmra.mrb[28].mxu1 %v2160_v60 }
  0xe2   : > { %1102 = vmatpush1.bf16.msra.mxu1 %v2203_v62 }
  0xe3   : > { %1103 = vmatprep.subr.bf16.mxu1 %v2208_v63 }
  0xe6   : > { %1104 = vmatpush1.bf16.msra.mxu1 %v2206_v1 }
 0x17b   : > { %v614_v8 = vpop.f32.mrb[0].mxu0  ;;  %v694_v9 = vpop.f32.mrb[0].mxu1 }
 0x17c   : > { %v615_v10 = vadd.f32 %v614_v8, %v2725_v6  ;;  %v616_v11 = vpop.f32.mrb[1].mxu0  ;;  %v695_v12 = vadd.f32 %v694_v9, %v2725_v6  ;;  %v696_v13 = vpop.f32.mrb[1].mxu1  ;;  %v2216_v8 = vld [vmem:[#allocation8 + $0x18] sm:$0xff]  }
 0x17d   : > { %v617_v14 = vadd.f32 %v616_v11, %v2729_v7  ;;  %v618_v15 = vpop.f32.mrb[2].mxu0  ;;  %v697_v16 = vadd.f32 %v696_v13, %v2729_v7  ;;  %v698_v17 = vpop.f32.mrb[2].mxu1  ;;  %v2217_v11 = vld [vmem:[#allocation8 + $0x60] sm:$0xff]   ;;  %1916 = vmatpush3.bf16.msra.mxu0 %v2216_v8 }
 0x17e   : > { %v619_v18 = vadd.f32 %v618_v15, %v2725_v6  ;;  %v620_v19 = vpop.f32.mrb[3].mxu0  ;;  %v805_v20 = vmax.f32 %v695_v12, 0.0  ;;  %v699_v21 = vadd.f32 %v698_v17, %v2725_v6  ;;  %v700_v22 = vpop.f32.mrb[3].mxu1  ;;  %v773_v29 = vmax.f32 %v615_v10, 0.0  ;;  %1917 = vmatprep.subr.bf16.mxu0 %v2217_v11 }
 0x17f   : > { %v621_v25 = vadd.f32 %v620_v19, %v2729_v7  ;;  %v806_v26 = vmax.f32 %v697_v16, 0.0  ;;  %v701_v27 = vadd.f32 %v700_v22, %v2729_v7  ;;  %v774_v32 = vmax.f32 %v617_v14, 0.0 }
 0x180   : > { %v775_v30 = vmax.f32 %v619_v18, 0.0  ;;  %v807_v31 = vmax.f32 %v699_v21, 0.0 }
 0x181   : > { %v776_v33 = vmax.f32 %v621_v25, 0.0  ;;  %v808_v34 = vmax.f32 %v701_v27, 0.0  ;;  %1918 = vmatpush3.bf16.msra.mxu0 %v2218_v24 }
 0x182   : > { %v837_v36 = vpack.c.bf16 %v775_v30, %v773_v29  ;;  %v2739_v37 = vpack.c.bf16 %v807_v31, %v805_v20  ;;  %v2219_v30 = vld [vmem:[#allocation8 + $0x68] sm:$0xff]  }
 0x183   : > { %v838_v39 = vpack.c.bf16 %v776_v33, %v774_v32  ;;  %v624_v40 = vpop.f32.mrb[4].mxu0  ;;  %v2741_v41 = vpack.c.bf16 %v808_v34, %v806_v26  ;;  %v704_v42 = vpop.f32.mrb[4].mxu1  ;;  %1919 = vmatprep.subr.bf16.mxu0 %v2219_v30 }
 0x184   : > { %v625_v43 = vadd.f32 %v624_v40, %v2725_v6  ;;  %v626_v44 = vpop.f32.mrb[5].mxu0  ;;  %v705_v45 = vadd.f32 %v704_v42, %v2725_v6  ;;  %v706_v46 = vpop.f32.mrb[5].mxu1  ;;  %v2220_v42 = vld [vmem:[#allocation8 + $0x28] sm:$0xff]  }
 0x185   : > { %v627_v47 = vadd.f32 %v626_v44, %v2729_v7  ;;  %v628_v48 = vpop.f32.mrb[6].mxu0  ;;  %1105 = vmatprep.mubr.bf16.mxu1 %v838_v39  ;;  %v707_v49 = vadd.f32 %v706_v46, %v2729_v7  ;;  %v708_v50 = vpop.f32.mrb[6].mxu1  ;;  %1920 = vmatpush3.bf16.msra.mxu0 %v2220_v42 }
 0x186   : > { %v629_v52 = vadd.f32 %v628_v48, %v2725_v6  ;;  %v630_v53 = vpop.f32.mrb[7].mxu0  ;;  %1106 = vmatmul.mubr.bf16.vlgmr.msra.gmra.mrb[32].mxu1 %v837_v36  ;;  %v809_v54 = vmax.f32 %v705_v45, 0.0  ;;  %v709_v55 = vadd.f32 %v708_v50, %v2725_v6  ;;  %v710_v56 = vpop.f32.mrb[7].mxu1  ;;  %v777_v61 = vmax.f32 %v625_v43, 0.0  ;;  %v2221_v45 = vld [vmem:[#allocation8 + $0x70] sm:$0xff]  }
 0x187   : > { %v631_v58 = vadd.f32 %v630_v53, %v2729_v7  ;;  %v810_v59 = vmax.f32 %v707_v49, 0.0  ;;  %v711_v60 = vadd.f32 %v710_v56, %v2729_v7  ;;  %v778_v1 = vmax.f32 %v627_v47, 0.0  ;;  %1921 = vmatprep.subr.bf16.mxu0 %v2221_v45 }
 0x188   : > { %v779_v62 = vmax.f32 %v629_v52, 0.0  ;;  %v811_v63 = vmax.f32 %v709_v55, 0.0 }
 0x189   : > { %v780_v2 = vmax.f32 %v631_v58, 0.0  ;;  %v812_v4 = vmax.f32 %v711_v60, 0.0  ;;  %v2222_v58 = vld [vmem:[#allocation8 + $0x30] sm:$0xff]  }
 0x18a   : > { %v839_v9 = vpack.c.bf16 %v779_v62, %v777_v61  ;;  %v2751_v10 = vpack.c.bf16 %v811_v63, %v809_v54  ;;  %1922 = vmatpush3.bf16.msra.mxu0 %v2222_v58 }
 0x18b   : > { %v840_v12 = vpack.c.bf16 %v780_v2, %v778_v1  ;;  %v634_v13 = vpop.f32.mrb[8].mxu0  ;;  %v2753_v14 = vpack.c.bf16 %v812_v4, %v810_v59  ;;  %v714_v15 = vpop.f32.mrb[8].mxu1 }
 0x18c   : > { %v635_v16 = vadd.f32 %v634_v13, %v2725_v6  ;;  %v636_v17 = vpop.f32.mrb[9].mxu0  ;;  %v715_v18 = vadd.f32 %v714_v15, %v2725_v6  ;;  %v716_v19 = vpop.f32.mrb[9].mxu1 }
 0x18d   : > { %v637_v20 = vadd.f32 %v636_v17, %v2729_v7  ;;  %v638_v21 = vpop.f32.mrb[10].mxu0  ;;  %1115 = vmatprep.mubr.bf16.mxu1 %v840_v12  ;;  %v717_v22 = vadd.f32 %v716_v19, %v2729_v7  ;;  %v718_v23 = vpop.f32.mrb[10].mxu1 }
 0x18e   : > { %v639_v25 = vadd.f32 %v638_v21, %v2725_v6  ;;  %v640_v26 = vpop.f32.mrb[11].mxu0  ;;  %1116 = vmatmul.mubr.bf16.gmra.mrb[36].mxu1 %v839_v9  ;;  %v813_v27 = vmax.f32 %v715_v18, 0.0  ;;  %v719_v28 = vadd.f32 %v718_v23, %v2725_v6  ;;  %v720_v29 = vpop.f32.mrb[11].mxu1  ;;  %v781_v34 = vmax.f32 %v635_v16, 0.0 }
 0x18f   : > { %v641_v31 = vadd.f32 %v640_v26, %v2729_v7  ;;  %v814_v32 = vmax.f32 %v717_v22, 0.0  ;;  %v721_v33 = vadd.f32 %v720_v29, %v2729_v7  ;;  %v782_v38 = vmax.f32 %v637_v20, 0.0 }
 0x190   : > { %v783_v35 = vmax.f32 %v639_v25, 0.0  ;;  %v815_v36 = vmax.f32 %v719_v28, 0.0 }
 0x191   : > { %v784_v39 = vmax.f32 %v641_v31, 0.0  ;;  %v816_v40 = vmax.f32 %v721_v33, 0.0 }
 0x192   : > { %v841_v43 = vpack.c.bf16 %v783_v35, %v781_v34  ;;  %v2763_v44 = vpack.c.bf16 %v815_v36, %v813_v27 }
 0x193   : > { %v842_v46 = vpack.c.bf16 %v784_v39, %v782_v38  ;;  %v644_v47 = vpop.f32.mrb[12].mxu0  ;;  %v2765_v48 = vpack.c.bf16 %v816_v40, %v814_v32  ;;  %v724_v49 = vpop.f32.mrb[12].mxu1 }
 0x194   : > { %v645_v50 = vadd.f32 %v644_v47, %v2725_v6  ;;  %v646_v51 = vpop.f32.mrb[13].mxu0  ;;  %v725_v52 = vadd.f32 %v724_v49, %v2725_v6  ;;  %v726_v53 = vpop.f32.mrb[13].mxu1 }
 0x195   : > { %v647_v54 = vadd.f32 %v646_v51, %v2729_v7  ;;  %v648_v55 = vpop.f32.mrb[14].mxu0  ;;  %1125 = vmatprep.mubr.bf16.mxu1 %v842_v46  ;;  %v727_v56 = vadd.f32 %v726_v53, %v2729_v7  ;;  %v728_v57 = vpop.f32.mrb[14].mxu1 }
 0x196   : > { %v649_v59 = vadd.f32 %v648_v55, %v2725_v6  ;;  %v650_v60 = vpop.f32.mrb[15].mxu0  ;;  %1126 = vmatmul.mubr.bf16.gmra.mrb[40].mxu1 %v841_v43  ;;  %v817_v61 = vmax.f32 %v725_v52, 0.0  ;;  %v729_v62 = vadd.f32 %v728_v57, %v2725_v6  ;;  %v730_v63 = vpop.f32.mrb[15].mxu1  ;;  %v785_v8 = vmax.f32 %v645_v50, 0.0 }
 0x197   : > { %v651_v1 = vadd.f32 %v650_v60, %v2729_v7  ;;  %v818_v2 = vmax.f32 %v727_v56, 0.0  ;;  %v731_v4 = vadd.f32 %v730_v63, %v2729_v7  ;;  %v786_v12 = vmax.f32 %v647_v54, 0.0 }
 0x198   : > { %v787_v9 = vmax.f32 %v649_v59, 0.0  ;;  %v819_v11 = vmax.f32 %v729_v62, 0.0 }
 0x199   : > { %v788_v13 = vmax.f32 %v651_v1, 0.0  ;;  %v820_v15 = vmax.f32 %v731_v4, 0.0 }
 0x19a   : > { %v843_v16 = vpack.c.bf16 %v787_v9, %v785_v8  ;;  %v2775_v17 = vpack.c.bf16 %v819_v11, %v817_v61 }
 0x19b   : > { %v844_v18 = vpack.c.bf16 %v788_v13, %v786_v12  ;;  %v654_v19 = vpop.f32.mrb[16].mxu0  ;;  %v2777_v20 = vpack.c.bf16 %v820_v15, %v818_v2  ;;  %v734_v21 = vpop.f32.mrb[16].mxu1 }
 0x19c   : > { %v655_v22 = vadd.f32 %v654_v19, %v2725_v6  ;;  %v656_v23 = vpop.f32.mrb[17].mxu0  ;;  %v735_v24 = vadd.f32 %v734_v21, %v2725_v6  ;;  %v736_v25 = vpop.f32.mrb[17].mxu1 }
 0x19d   : > { %v657_v26 = vadd.f32 %v656_v23, %v2729_v7  ;;  %v658_v27 = vpop.f32.mrb[18].mxu0  ;;  %1135 = vmatprep.mubr.bf16.mxu1 %v844_v18  ;;  %v737_v28 = vadd.f32 %v736_v25, %v2729_v7  ;;  %v738_v29 = vpop.f32.mrb[18].mxu1 }
 0x19e   : > { %v659_v30 = vadd.f32 %v658_v27, %v2725_v6  ;;  %v660_v31 = vpop.f32.mrb[19].mxu0  ;;  %1136 = vmatmul.mubr.bf16.gmra.mrb[44].mxu1 %v843_v16  ;;  %v821_v32 = vmax.f32 %v735_v24, 0.0  ;;  %v739_v33 = vadd.f32 %v738_v29, %v2725_v6  ;;  %v740_v34 = vpop.f32.mrb[19].mxu1  ;;  %v789_v39 = vmax.f32 %v655_v22, 0.0 }
 0x19f   : > { %v661_v35 = vadd.f32 %v660_v31, %v2729_v7  ;;  %v822_v36 = vmax.f32 %v737_v28, 0.0  ;;  %v741_v38 = vadd.f32 %v740_v34, %v2729_v7  ;;  %v790_v43 = vmax.f32 %v657_v26, 0.0 }
 0x1a0   : > { %v791_v40 = vmax.f32 %v659_v30, 0.0  ;;  %v823_v42 = vmax.f32 %v739_v33, 0.0 }
 0x1a1   : > { %v792_v45 = vmax.f32 %v661_v35, 0.0  ;;  %v824_v46 = vmax.f32 %v741_v38, 0.0 }
 0x1a2   : > { %v845_v47 = vpack.c.bf16 %v791_v40, %v789_v39  ;;  %v2787_v49 = vpack.c.bf16 %v823_v42, %v821_v32 }
 0x1a3   : > { %v846_v50 = vpack.c.bf16 %v792_v45, %v790_v43  ;;  %v664_v51 = vpop.f32.mrb[20].mxu0  ;;  %v2789_v52 = vpack.c.bf16 %v824_v46, %v822_v36  ;;  %v744_v53 = vpop.f32.mrb[20].mxu1 }
 0x1a4   : > { %v665_v54 = vadd.f32 %v664_v51, %v2725_v6  ;;  %v666_v55 = vpop.f32.mrb[21].mxu0  ;;  %v745_v56 = vadd.f32 %v744_v53, %v2725_v6  ;;  %v746_v57 = vpop.f32.mrb[21].mxu1 }
 0x1a5   : > { %v667_v58 = vadd.f32 %v666_v55, %v2729_v7  ;;  %v668_v59 = vpop.f32.mrb[22].mxu0  ;;  %1145 = vmatprep.mubr.bf16.mxu1 %v846_v50  ;;  %v747_v60 = vadd.f32 %v746_v57, %v2729_v7  ;;  %v748_v61 = vpop.f32.mrb[22].mxu1 }
 0x1a6   : > { %v669_v62 = vadd.f32 %v668_v59, %v2725_v6  ;;  %v670_v63 = vpop.f32.mrb[23].mxu0  ;;  %1146 = vmatmul.mubr.bf16.gmra.mrb[48].mxu1 %v845_v47  ;;  %v825_v1 = vmax.f32 %v745_v56, 0.0  ;;  %v749_v2 = vadd.f32 %v748_v61, %v2725_v6  ;;  %v750_v4 = vpop.f32.mrb[23].mxu1  ;;  %v793_v12 = vmax.f32 %v665_v54, 0.0 }
 0x1a7   : > { %v671_v8 = vadd.f32 %v670_v63, %v2729_v7  ;;  %v826_v9 = vmax.f32 %v747_v60, 0.0  ;;  %v751_v11 = vadd.f32 %v750_v4, %v2729_v7  ;;  %v794_v16 = vmax.f32 %v667_v58, 0.0 }
 0x1a8   : > { %v795_v13 = vmax.f32 %v669_v62, 0.0  ;;  %v827_v15 = vmax.f32 %v749_v2, 0.0 }
 0x1a9   : > { %v796_v18 = vmax.f32 %v671_v8, 0.0  ;;  %v828_v19 = vmax.f32 %v751_v11, 0.0 }
 0x1aa   : > { %v847_v21 = vpack.c.bf16 %v795_v13, %v793_v12  ;;  %v2799_v22 = vpack.c.bf16 %v827_v15, %v825_v1 }
 0x1ab   : > { %v848_v23 = vpack.c.bf16 %v796_v18, %v794_v16  ;;  %v674_v24 = vpop.f32.mrb[24].mxu0  ;;  %v2801_v25 = vpack.c.bf16 %v828_v19, %v826_v9  ;;  %v754_v26 = vpop.f32.mrb[24].mxu1 }
 0x1ac   : > { %v675_v27 = vadd.f32 %v674_v24, %v2725_v6  ;;  %v676_v28 = vpop.f32.mrb[25].mxu0  ;;  %v755_v29 = vadd.f32 %v754_v26, %v2725_v6  ;;  %v756_v30 = vpop.f32.mrb[25].mxu1 }
 0x1ad   : > { %v677_v31 = vadd.f32 %v676_v28, %v2729_v7  ;;  %v678_v32 = vpop.f32.mrb[26].mxu0  ;;  %1155 = vmatprep.mubr.bf16.mxu1 %v848_v23  ;;  %v757_v33 = vadd.f32 %v756_v30, %v2729_v7  ;;  %v758_v34 = vpop.f32.mrb[26].mxu1 }
 0x1ae   : > { %v679_v35 = vadd.f32 %v678_v32, %v2725_v6  ;;  %v680_v36 = vpop.f32.mrb[27].mxu0  ;;  %1156 = vmatmul.mubr.bf16.gmra.mrb[52].mxu1 %v847_v21  ;;  %v829_v38 = vmax.f32 %v755_v29, 0.0  ;;  %v759_v39 = vadd.f32 %v758_v34, %v2725_v6  ;;  %v760_v40 = vpop.f32.mrb[27].mxu1  ;;  %v797_v46 = vmax.f32 %v675_v27, 0.0 }
 0x1af   : > { %v681_v42 = vadd.f32 %v680_v36, %v2729_v7  ;;  %v830_v43 = vmax.f32 %v757_v33, 0.0  ;;  %v761_v45 = vadd.f32 %v760_v40, %v2729_v7  ;;  %v798_v51 = vmax.f32 %v677_v31, 0.0 }
 0x1b0   : > { %v799_v47 = vmax.f32 %v679_v35, 0.0  ;;  %v831_v50 = vmax.f32 %v759_v39, 0.0 }
 0x1b1   : > { %v800_v53 = vmax.f32 %v681_v42, 0.0  ;;  %v832_v54 = vmax.f32 %v761_v45, 0.0 }
 0x1b2   : > { %v849_v55 = vpack.c.bf16 %v799_v47, %v797_v46  ;;  %v865_v56 = vpack.c.bf16 %v831_v50, %v829_v38 }
 0x1b3   : > { %v850_v57 = vpack.c.bf16 %v800_v53, %v798_v51  ;;  %v684_v58 = vpop.f32.mrb[28].mxu0  ;;  %v866_v59 = vpack.c.bf16 %v832_v54, %v830_v43  ;;  %v764_v60 = vpop.f32.mrb[28].mxu1 }
 0x1b4   : > { %v685_v61 = vadd.f32 %v684_v58, %v2725_v6  ;;  %v686_v62 = vpop.f32.mrb[29].mxu0  ;;  %v765_v63 = vadd.f32 %v764_v60, %v2725_v6  ;;  %v766_v1 = vpop.f32.mrb[29].mxu1 }
 0x1b5   : > { %v687_v2 = vadd.f32 %v686_v62, %v2729_v7  ;;  %v688_v4 = vpop.f32.mrb[30].mxu0  ;;  %1165 = vmatprep.mubr.bf16.mxu1 %v850_v57  ;;  %v767_v8 = vadd.f32 %v766_v1, %v2729_v7  ;;  %v768_v9 = vpop.f32.mrb[30].mxu1 }
 0x1b6   : > { %v689_v11 = vadd.f32 %v688_v4, %v2725_v6  ;;  %v690_v12 = vpop.f32.mrb[31].mxu0  ;;  %1166 = vmatmul.mubr.bf16.gmra.mrb[56].mxu1 %v849_v55  ;;  %v833_v13 = vmax.f32 %v765_v63, 0.0  ;;  %v769_v15 = vadd.f32 %v768_v9, %v2725_v6  ;;  %v770_v16 = vpop.f32.mrb[31].mxu1  ;;  %v801_v23 = vmax.f32 %v685_v61, 0.0  ;;  %v2223_v6 = vld [vmem:[#allocation8 + $0x78] sm:$0xff]  }
 0x1b7   : > { %v691_v18 = vadd.f32 %v690_v12, %v2729_v7  ;;  %v834_v19 = vmax.f32 %v767_v8, 0.0  ;;  %v771_v21 = vadd.f32 %v770_v16, %v2729_v7  ;;  %v802_v27 = vmax.f32 %v687_v2, 0.0  ;;  %v2224_v7 = vld [vmem:[#allocation8 + $0x38] sm:$0xff]   ;;  %1923 = vmatprep.subr.bf16.mxu0 %v2223_v6 }
 0x1b8   : > { %v803_v24 = vmax.f32 %v689_v11, 0.0  ;;  %v835_v26 = vmax.f32 %v769_v15, 0.0  ;;  %1924 = vmatpush3.bf16.msra.mxu0 %v2224_v7 }
 0x1b9   : > { %v804_v28 = vmax.f32 %v691_v18, 0.0  ;;  %v836_v29 = vmax.f32 %v771_v21, 0.0 }
 0x1ba   : > { %v851_v30 = vpack.c.bf16 %v803_v24, %v801_v23  ;;  %v867_v31 = vpack.c.bf16 %v835_v26, %v833_v13 }
 0x1bb   : > { %v852_v32 = vpack.c.bf16 %v804_v28, %v802_v27  ;;  %v868_v33 = vpack.c.bf16 %v836_v29, %v834_v19 }
 0x1bd   : > { %1175 = vmatprep.mubr.bf16.mxu1 %v852_v32 }
 0x1be   : > { %1176 = vmatmul.mubr.bf16.gmra.mrb[60].mxu1 %v851_v30 }
 0x1bf   : > { %1185 = vmatprep.mubr.bf16.mxu1 %v2741_v41 }
 0x1c6   : > { %1186 = vmatmul.mubr.bf16.gmra.mrb[64].mxu1 %v2739_v37  ;;  %v901_v37 = vld [vmem:[%s3033_s4] sm:$0x3] }
 0x1c7   : > { %1195 = vmatprep.mubr.bf16.mxu1 %v2753_v14  ;;  %v2836_v41 = vrot.slane %v901_v37, %v396_v0 }
 0x1ce   : > { %1196 = vmatmul.mubr.bf16.gmra.mrb[68].mxu1 %v2751_v10  ;;  %v2840_v10 = vrot.slane %v901_v37, %v400_v5 }
 0x1cf   : > { %1205 = vmatprep.mubr.bf16.mxu1 %v2765_v48 }
 0x1d6   : > { %1206 = vmatmul.mubr.bf16.gmra.mrb[72].mxu1 %v2763_v44 }
 0x1d7   : > { %1215 = vmatprep.mubr.bf16.mxu1 %v2777_v20 }
 0x1de   : > { %1216 = vmatmul.mubr.bf16.gmra.mrb[76].mxu1 %v2775_v17 }
 0x1df   : > { %1225 = vmatprep.mubr.bf16.mxu1 %v2789_v52 }
 0x1e6   : > { %1226 = vmatmul.mubr.bf16.gmra.mrb[80].mxu1 %v2787_v49 }
 0x1e7   : > { %1235 = vmatprep.mubr.bf16.mxu1 %v2801_v25 }
 0x1ee   : > { %1236 = vmatmul.mubr.bf16.gmra.mrb[84].mxu1 %v2799_v22 }
 0x1ef   : > { %1245 = vmatprep.mubr.bf16.mxu1 %v866_v59 }
 0x1f6   : > { %1246 = vmatmul.mubr.bf16.gmra.mrb[88].mxu1 %v865_v56 }
 0x1f7   : > { %1255 = vmatprep.mubr.bf16.mxu1 %v868_v33 }
 0x1fe   : > { %1256 = vmatmul.mubr.bf16.gmra.mrb[92].mxu1 %v867_v31 }
 0x259   : > { %v1107_v14 = vpop.f32.mrb[32].mxu1 }
 0x25a   : > { %v1108_v44 = vadd.f32 %v1107_v14, %v2836_v41  ;;  %v1109_v48 = vpop.f32.mrb[33].mxu1 }
 0x25b   : > { %v1110_v17 = vadd.f32 %v1109_v48, %v2840_v10  ;;  %v1111_v20 = vpop.f32.mrb[34].mxu1 }
 0x25c   : > { %v1112_v49 = vadd.f32 %v1111_v20, %v2836_v41  ;;  %v1113_v52 = vpop.f32.mrb[35].mxu1  ;;  %v1266_v25 = vmax.f32 %v1108_v44, 0.0 }
 0x25d   : > { %v1114_v22 = vadd.f32 %v1113_v52, %v2840_v10  ;;  %v1267_v0 = vmax.f32 %v1110_v17, 0.0 }
 0x25e   : > { %v1268_v34 = vmax.f32 %v1112_v49, 0.0 }
 0x25f   : > { %v1269_v35 = vmax.f32 %v1114_v22, 0.0 }
 0x260   : > { %v1330_v36 = vpack.c.bf16 %v1268_v34, %v1266_v25 }
 0x261   : > { %v1331_v3 = vpack.c.bf16 %v1269_v35, %v1267_v0  ;;  %v1117_v5 = vpop.f32.mrb[36].mxu1 }
 0x262   : > { %v1118_v38 = vadd.f32 %v1117_v5, %v2836_v41  ;;  %v1119_v39 = vpop.f32.mrb[37].mxu1 }
 0x263   : > { %v1120_v40 = vadd.f32 %v1119_v39, %v2840_v10  ;;  %v1121_v42 = vpop.f32.mrb[38].mxu1  ;;  %1529 = vmatprep.mubr.bf16.mxu0 %v1331_v3 }
 0x264   : > { %v1122_v43 = vadd.f32 %v1121_v42, %v2836_v41  ;;  %v1123_v45 = vpop.f32.mrb[39].mxu1  ;;  %1530 = vmatmul.mubr.bf16.vlgmr.msra.gmra.mrb[32].mxu0 %v1330_v36  ;;  %v1270_v47 = vmax.f32 %v1118_v38, 0.0 }
 0x265   : > { %v1124_v46 = vadd.f32 %v1123_v45, %v2840_v10  ;;  %v1271_v51 = vmax.f32 %v1120_v40, 0.0 }
 0x266   : > { %v1272_v50 = vmax.f32 %v1122_v43, 0.0 }
 0x267   : > { %v1273_v53 = vmax.f32 %v1124_v46, 0.0 }
 0x268   : > { %v1332_v54 = vpack.c.bf16 %v1272_v50, %v1270_v47 }
 0x269   : > { %v1333_v55 = vpack.c.bf16 %v1273_v53, %v1271_v51  ;;  %v1127_v56 = vpop.f32.mrb[40].mxu1 }
 0x26a   : > { %v1128_v57 = vadd.f32 %v1127_v56, %v2836_v41  ;;  %v1129_v58 = vpop.f32.mrb[41].mxu1 }
 0x26b   : > { %v1130_v59 = vadd.f32 %v1129_v58, %v2840_v10  ;;  %v1131_v60 = vpop.f32.mrb[42].mxu1  ;;  %1537 = vmatprep.mubr.bf16.mxu0 %v1333_v55 }
 0x26c   : > { %v1132_v61 = vadd.f32 %v1131_v60, %v2836_v41  ;;  %v1133_v62 = vpop.f32.mrb[43].mxu1  ;;  %1538 = vmatmul.mubr.bf16.gmra.mrb[36].mxu0 %v1332_v54  ;;  %v1274_v1 = vmax.f32 %v1128_v57, 0.0 }
 0x26d   : > { %v1134_v63 = vadd.f32 %v1133_v62, %v2840_v10  ;;  %v1275_v4 = vmax.f32 %v1130_v59, 0.0 }
 0x26e   : > { %v1276_v2 = vmax.f32 %v1132_v61, 0.0 }
 0x26f   : > { %v1277_v8 = vmax.f32 %v1134_v63, 0.0 }
 0x270   : > { %v1334_v9 = vpack.c.bf16 %v1276_v2, %v1274_v1 }
 0x271   : > { %v1335_v11 = vpack.c.bf16 %v1277_v8, %v1275_v4  ;;  %v1137_v12 = vpop.f32.mrb[44].mxu1 }
 0x272   : > { %v1138_v13 = vadd.f32 %v1137_v12, %v2836_v41  ;;  %v1139_v15 = vpop.f32.mrb[45].mxu1 }
 0x273   : > { %v1140_v16 = vadd.f32 %v1139_v15, %v2840_v10  ;;  %v1141_v18 = vpop.f32.mrb[46].mxu1  ;;  %1545 = vmatprep.mubr.bf16.mxu0 %v1335_v11 }
 0x274   : > { %v1142_v19 = vadd.f32 %v1141_v18, %v2836_v41  ;;  %v1143_v21 = vpop.f32.mrb[47].mxu1  ;;  %1546 = vmatmul.mubr.bf16.gmra.mrb[40].mxu0 %v1334_v9  ;;  %v1278_v24 = vmax.f32 %v1138_v13, 0.0 }
 0x275   : > { %v1144_v23 = vadd.f32 %v1143_v21, %v2840_v10  ;;  %v1279_v27 = vmax.f32 %v1140_v16, 0.0 }
 0x276   : > { %v1280_v26 = vmax.f32 %v1142_v19, 0.0 }
 0x277   : > { %v1281_v28 = vmax.f32 %v1144_v23, 0.0 }
 0x278   : > { %v1336_v29 = vpack.c.bf16 %v1280_v26, %v1278_v24 }
 0x279   : > { %v1337_v30 = vpack.c.bf16 %v1281_v28, %v1279_v27  ;;  %v1147_v31 = vpop.f32.mrb[48].mxu1 }
 0x27a   : > { %v1148_v32 = vadd.f32 %v1147_v31, %v2836_v41  ;;  %v1149_v33 = vpop.f32.mrb[49].mxu1 }
 0x27b   : > { %v1150_v6 = vadd.f32 %v1149_v33, %v2840_v10  ;;  %v1151_v7 = vpop.f32.mrb[50].mxu1  ;;  %1553 = vmatprep.mubr.bf16.mxu0 %v1337_v30 }
 0x27c   : > { %v1152_v37 = vadd.f32 %v1151_v7, %v2836_v41  ;;  %v1153_v14 = vpop.f32.mrb[51].mxu1  ;;  %1554 = vmatmul.mubr.bf16.gmra.mrb[44].mxu0 %v1336_v29  ;;  %v1282_v48 = vmax.f32 %v1148_v32, 0.0 }
 0x27d   : > { %v1154_v44 = vadd.f32 %v1153_v14, %v2840_v10  ;;  %v1283_v20 = vmax.f32 %v1150_v6, 0.0 }
 0x27e   : > { %v1284_v17 = vmax.f32 %v1152_v37, 0.0 }
 0x27f   : > { %v1285_v49 = vmax.f32 %v1154_v44, 0.0 }
 0x280   : > { %v1338_v52 = vpack.c.bf16 %v1284_v17, %v1282_v48 }
 0x281   : > { %v1339_v22 = vpack.c.bf16 %v1285_v49, %v1283_v20  ;;  %v1157_v25 = vpop.f32.mrb[52].mxu1 }
 0x282   : > { %v1158_v34 = vadd.f32 %v1157_v25, %v2836_v41  ;;  %v1159_v0 = vpop.f32.mrb[53].mxu1 }
 0x283   : > { %v1160_v35 = vadd.f32 %v1159_v0, %v2840_v10  ;;  %v1161_v36 = vpop.f32.mrb[54].mxu1  ;;  %1561 = vmatprep.mubr.bf16.mxu0 %v1339_v22 }
 0x284   : > { %v1162_v3 = vadd.f32 %v1161_v36, %v2836_v41  ;;  %v1163_v5 = vpop.f32.mrb[55].mxu1  ;;  %1562 = vmatmul.mubr.bf16.gmra.mrb[48].mxu0 %v1338_v52  ;;  %v1286_v39 = vmax.f32 %v1158_v34, 0.0 }
 0x285   : > { %v1164_v38 = vadd.f32 %v1163_v5, %v2840_v10  ;;  %v1287_v42 = vmax.f32 %v1160_v35, 0.0 }
 0x286   : > { %v1288_v40 = vmax.f32 %v1162_v3, 0.0 }
 0x287   : > { %v1289_v43 = vmax.f32 %v1164_v38, 0.0 }
 0x288   : > { %v1340_v45 = vpack.c.bf16 %v1288_v40, %v1286_v39 }
 0x289   : > { %v1341_v46 = vpack.c.bf16 %v1289_v43, %v1287_v42  ;;  %v1167_v47 = vpop.f32.mrb[56].mxu1 }
 0x28a   : > { %v1168_v50 = vadd.f32 %v1167_v47, %v2836_v41  ;;  %v1169_v51 = vpop.f32.mrb[57].mxu1 }
 0x28b   : > { %v1170_v53 = vadd.f32 %v1169_v51, %v2840_v10  ;;  %v1171_v54 = vpop.f32.mrb[58].mxu1  ;;  %1569 = vmatprep.mubr.bf16.mxu0 %v1341_v46 }
 0x28c   : > { %v1172_v55 = vadd.f32 %v1171_v54, %v2836_v41  ;;  %v1173_v56 = vpop.f32.mrb[59].mxu1  ;;  %1570 = vmatmul.mubr.bf16.gmra.mrb[52].mxu0 %v1340_v45  ;;  %v1290_v58 = vmax.f32 %v1168_v50, 0.0 }
 0x28d   : > { %v1174_v57 = vadd.f32 %v1173_v56, %v2840_v10  ;;  %v1291_v60 = vmax.f32 %v1170_v53, 0.0 }
 0x28e   : > { %v1292_v59 = vmax.f32 %v1172_v55, 0.0 }
 0x28f   : > { %v1293_v61 = vmax.f32 %v1174_v57, 0.0 }
 0x290   : > { %v1342_v62 = vpack.c.bf16 %v1292_v59, %v1290_v58 }
 0x291   : > { %v1343_v63 = vpack.c.bf16 %v1293_v61, %v1291_v60  ;;  %v1177_v1 = vpop.f32.mrb[60].mxu1 }
 0x292   : > { %v1178_v2 = vadd.f32 %v1177_v1, %v2836_v41  ;;  %v1179_v4 = vpop.f32.mrb[61].mxu1 }
 0x293   : > { %v1180_v8 = vadd.f32 %v1179_v4, %v2840_v10  ;;  %v1181_v9 = vpop.f32.mrb[62].mxu1  ;;  %1577 = vmatprep.mubr.bf16.mxu0 %v1343_v63 }
 0x294   : > { %v1182_v11 = vadd.f32 %v1181_v9, %v2836_v41  ;;  %v1183_v12 = vpop.f32.mrb[63].mxu1  ;;  %1578 = vmatmul.mubr.bf16.gmra.mrb[56].mxu0 %v1342_v62  ;;  %v1294_v15 = vmax.f32 %v1178_v2, 0.0 }
 0x295   : > { %v1184_v13 = vadd.f32 %v1183_v12, %v2840_v10  ;;  %v1295_v18 = vmax.f32 %v1180_v8, 0.0 }
 0x296   : > { %v1296_v16 = vmax.f32 %v1182_v11, 0.0 }
 0x297   : > { %v1297_v19 = vmax.f32 %v1184_v13, 0.0 }
 0x298   : > { %v1344_v21 = vpack.c.bf16 %v1296_v16, %v1294_v15 }
 0x299   : > { %v1345_v23 = vpack.c.bf16 %v1297_v19, %v1295_v18  ;;  %v1187_v24 = vpop.f32.mrb[64].mxu1 }
 0x29a   : > { %v1188_v26 = vadd.f32 %v1187_v24, %v2836_v41  ;;  %v1189_v27 = vpop.f32.mrb[65].mxu1 }
 0x29b   : > { %v1190_v28 = vadd.f32 %v1189_v27, %v2840_v10  ;;  %v1191_v29 = vpop.f32.mrb[66].mxu1  ;;  %1585 = vmatprep.mubr.bf16.mxu0 %v1345_v23 }
 0x29c   : > { %v1192_v30 = vadd.f32 %v1191_v29, %v2836_v41  ;;  %v1193_v31 = vpop.f32.mrb[67].mxu1  ;;  %1586 = vmatmul.mubr.bf16.gmra.mrb[60].mxu0 %v1344_v21  ;;  %v1298_v33 = vmax.f32 %v1188_v26, 0.0 }
 0x29d   : > { %v1194_v32 = vadd.f32 %v1193_v31, %v2840_v10  ;;  %v1299_v7 = vmax.f32 %v1190_v28, 0.0 }
 0x29e   : > { %v1300_v6 = vmax.f32 %v1192_v30, 0.0 }
 0x29f   : > { %v1301_v37 = vmax.f32 %v1194_v32, 0.0 }
 0x2a0   : > { %v1346_v14 = vpack.c.bf16 %v1300_v6, %v1298_v33 }
 0x2a1   : > { %v1347_v44 = vpack.c.bf16 %v1301_v37, %v1299_v7  ;;  %v1197_v48 = vpop.f32.mrb[68].mxu1 }
 0x2a2   : > { %v1198_v17 = vadd.f32 %v1197_v48, %v2836_v41  ;;  %v1199_v20 = vpop.f32.mrb[69].mxu1 }
 0x2a3   : > { %v1200_v49 = vadd.f32 %v1199_v20, %v2840_v10  ;;  %v1201_v52 = vpop.f32.mrb[70].mxu1  ;;  %1593 = vmatprep.mubr.bf16.mxu0 %v1347_v44 }
 0x2a4   : > { %v1202_v22 = vadd.f32 %v1201_v52, %v2836_v41  ;;  %v1203_v25 = vpop.f32.mrb[71].mxu1  ;;  %1594 = vmatmul.mubr.bf16.gmra.mrb[64].mxu0 %v1346_v14  ;;  %v1302_v0 = vmax.f32 %v1198_v17, 0.0 }
 0x2a5   : > { %v1204_v34 = vadd.f32 %v1203_v25, %v2840_v10  ;;  %v1303_v36 = vmax.f32 %v1200_v49, 0.0 }
 0x2a6   : > { %v1304_v35 = vmax.f32 %v1202_v22, 0.0 }
 0x2a7   : > { %v1305_v3 = vmax.f32 %v1204_v34, 0.0 }
 0x2a8   : > { %v1348_v5 = vpack.c.bf16 %v1304_v35, %v1302_v0 }
 0x2a9   : > { %v1349_v38 = vpack.c.bf16 %v1305_v3, %v1303_v36  ;;  %v1207_v39 = vpop.f32.mrb[72].mxu1 }
 0x2aa   : > { %v1208_v40 = vadd.f32 %v1207_v39, %v2836_v41  ;;  %v1209_v42 = vpop.f32.mrb[73].mxu1 }
 0x2ab   : > { %v1210_v43 = vadd.f32 %v1209_v42, %v2840_v10  ;;  %v1211_v45 = vpop.f32.mrb[74].mxu1  ;;  %1601 = vmatprep.mubr.bf16.mxu0 %v1349_v38 }
 0x2ac   : > { %v1212_v46 = vadd.f32 %v1211_v45, %v2836_v41  ;;  %v1213_v47 = vpop.f32.mrb[75].mxu1  ;;  %1602 = vmatmul.mubr.bf16.gmra.mrb[68].mxu0 %v1348_v5  ;;  %v1306_v51 = vmax.f32 %v1208_v40, 0.0 }
 0x2ad   : > { %v1214_v50 = vadd.f32 %v1213_v47, %v2840_v10  ;;  %v1307_v54 = vmax.f32 %v1210_v43, 0.0 }
 0x2ae   : > { %v1308_v53 = vmax.f32 %v1212_v46, 0.0 }
 0x2af   : > { %v1309_v55 = vmax.f32 %v1214_v50, 0.0 }
 0x2b0   : > { %v1350_v56 = vpack.c.bf16 %v1308_v53, %v1306_v51 }
 0x2b1   : > { %v1351_v57 = vpack.c.bf16 %v1309_v55, %v1307_v54  ;;  %v1217_v58 = vpop.f32.mrb[76].mxu1 }
 0x2b2   : > { %v1218_v59 = vadd.f32 %v1217_v58, %v2836_v41  ;;  %v1219_v60 = vpop.f32.mrb[77].mxu1 }
 0x2b3   : > { %v1220_v61 = vadd.f32 %v1219_v60, %v2840_v10  ;;  %v1221_v62 = vpop.f32.mrb[78].mxu1  ;;  %1609 = vmatprep.mubr.bf16.mxu0 %v1351_v57 }
 0x2b4   : > { %v1222_v63 = vadd.f32 %v1221_v62, %v2836_v41  ;;  %v1223_v1 = vpop.f32.mrb[79].mxu1  ;;  %1610 = vmatmul.mubr.bf16.gmra.mrb[72].mxu0 %v1350_v56  ;;  %v1310_v4 = vmax.f32 %v1218_v59, 0.0 }
 0x2b5   : > { %v1224_v2 = vadd.f32 %v1223_v1, %v2840_v10  ;;  %v1311_v9 = vmax.f32 %v1220_v61, 0.0 }
 0x2b6   : > { %v1312_v8 = vmax.f32 %v1222_v63, 0.0 }
 0x2b7   : > { %v1313_v11 = vmax.f32 %v1224_v2, 0.0 }
 0x2b8   : > { %v1352_v12 = vpack.c.bf16 %v1312_v8, %v1310_v4  ;;  %v2910_v8 = vld [vmem:[%s3035_s6] ss:$0 sm:$0xff] }
 0x2b9   : > { %v1353_v13 = vpack.c.bf16 %v1313_v11, %v1311_v9  ;;  %v1227_v15 = vpop.f32.mrb[80].mxu1 }
 0x2ba   : > { %v1228_v16 = vadd.f32 %v1227_v15, %v2836_v41  ;;  %v1229_v18 = vpop.f32.mrb[81].mxu1 }
 0x2bb   : > { %v1230_v19 = vadd.f32 %v1229_v18, %v2840_v10  ;;  %v1231_v21 = vpop.f32.mrb[82].mxu1  ;;  %1617 = vmatprep.mubr.bf16.mxu0 %v1353_v13 }
 0x2bc   : > { %v1232_v23 = vadd.f32 %v1231_v21, %v2836_v41  ;;  %v1233_v24 = vpop.f32.mrb[83].mxu1  ;;  %1618 = vmatmul.mubr.bf16.gmra.mrb[76].mxu0 %v1352_v12  ;;  %v1314_v27 = vmax.f32 %v1228_v16, 0.0 }
 0x2bd   : > { %v1234_v26 = vadd.f32 %v1233_v24, %v2840_v10  ;;  %v1315_v29 = vmax.f32 %v1230_v19, 0.0 }
 0x2be   : > { %v1316_v28 = vmax.f32 %v1232_v23, 0.0 }
 0x2bf   : > { %v1317_v30 = vmax.f32 %v1234_v26, 0.0 }
 0x2c0   : > { %v1354_v31 = vpack.c.bf16 %v1316_v28, %v1314_v27 }
 0x2c1   : > { %v1355_v32 = vpack.c.bf16 %v1317_v30, %v1315_v29  ;;  %v1237_v33 = vpop.f32.mrb[84].mxu1 }
 0x2c2   : > { %v1238_v6 = vadd.f32 %v1237_v33, %v2836_v41  ;;  %v1239_v7 = vpop.f32.mrb[85].mxu1 }
 0x2c3   : > { %v1240_v37 = vadd.f32 %v1239_v7, %v2840_v10  ;;  %v1241_v14 = vpop.f32.mrb[86].mxu1  ;;  %1625 = vmatprep.mubr.bf16.mxu0 %v1355_v32 }
 0x2c4   : > { %v1242_v44 = vadd.f32 %v1241_v14, %v2836_v41  ;;  %v1243_v48 = vpop.f32.mrb[87].mxu1  ;;  %1626 = vmatmul.mubr.bf16.gmra.mrb[80].mxu0 %v1354_v31  ;;  %v1318_v20 = vmax.f32 %v1238_v6, 0.0 }
 0x2c5   : > { %v1244_v17 = vadd.f32 %v1243_v48, %v2840_v10  ;;  %v1319_v52 = vmax.f32 %v1240_v37, 0.0 }
 0x2c6   : > { %v1320_v49 = vmax.f32 %v1242_v44, 0.0 }
 0x2c7   : > { %v1321_v22 = vmax.f32 %v1244_v17, 0.0 }
 0x2c8   : > { %v1356_v25 = vpack.c.bf16 %v1320_v49, %v1318_v20 }
 0x2c9   : > { %v1357_v34 = vpack.c.bf16 %v1321_v22, %v1319_v52  ;;  %v1247_v0 = vpop.f32.mrb[88].mxu1 }
 0x2ca   : > { %v1248_v35 = vadd.f32 %v1247_v0, %v2836_v41  ;;  %v1249_v36 = vpop.f32.mrb[89].mxu1 }
 0x2cb   : > { %v1250_v3 = vadd.f32 %v1249_v36, %v2840_v10  ;;  %v1251_v5 = vpop.f32.mrb[90].mxu1  ;;  %1633 = vmatprep.mubr.bf16.mxu0 %v1357_v34 }
 0x2cc   : > { %v1252_v38 = vadd.f32 %v1251_v5, %v2836_v41  ;;  %v1253_v39 = vpop.f32.mrb[91].mxu1  ;;  %1634 = vmatmul.mubr.bf16.gmra.mrb[84].mxu0 %v1356_v25  ;;  %v1322_v42 = vmax.f32 %v1248_v35, 0.0 }
 0x2cd   : > { %v1254_v40 = vadd.f32 %v1253_v39, %v2840_v10  ;;  %v1323_v45 = vmax.f32 %v1250_v3, 0.0 }
 0x2ce   : > { %v1324_v43 = vmax.f32 %v1252_v38, 0.0 }
 0x2cf   : > { %v1325_v46 = vmax.f32 %v1254_v40, 0.0 }
 0x2d0   : > { %v1358_v47 = vpack.c.bf16 %v1324_v43, %v1322_v42 }
 0x2d1   : > { %v1359_v50 = vpack.c.bf16 %v1325_v46, %v1323_v45  ;;  %v1257_v51 = vpop.f32.mrb[92].mxu1 }
 0x2d2   : > { %v1258_v53 = vadd.f32 %v1257_v51, %v2836_v41  ;;  %v1259_v54 = vpop.f32.mrb[93].mxu1 }
 0x2d3   : > { %v1260_v55 = vadd.f32 %v1259_v54, %v2840_v10  ;;  %v1261_v56 = vpop.f32.mrb[94].mxu1  ;;  %1641 = vmatprep.mubr.bf16.mxu0 %v1359_v50 }
 0x2d4   : > { %v1262_v57 = vadd.f32 %v1261_v56, %v2836_v41  ;;  %v1263_v58 = vpop.f32.mrb[95].mxu1  ;;  %1642 = vmatmul.mubr.bf16.gmra.mrb[88].mxu0 %v1358_v47  ;;  %v1326_v60 = vmax.f32 %v1258_v53, 0.0 }
 0x2d5   : > { %v1264_v59 = vadd.f32 %v1263_v58, %v2840_v10  ;;  %v1327_v62 = vmax.f32 %v1260_v55, 0.0 }
 0x2d6   : > { %v1328_v61 = vmax.f32 %v1262_v57, 0.0 }
 0x2d7   : > { %v1329_v63 = vmax.f32 %v1264_v59, 0.0 }
 0x2d8   : > { %v1360_v1 = vpack.c.bf16 %v1328_v61, %v1326_v60 }
 0x2d9   : > { %v1361_v2 = vpack.c.bf16 %v1329_v63, %v1327_v62 }
 0x2db   : > { %1649 = vmatprep.mubr.bf16.mxu0 %v1361_v2 }
 0x2dc   : > { %1650 = vmatmul.mubr.bf16.gmra.mrb[92].mxu0 %v1360_v1 }
 0x337   : > { %v1925_v4 = vpop.f32.mrb[32].mxu0 }
 0x338   : > { %v1926_v41 = vpop.f32.mrb[33].mxu0 }
 0x339   : > { %v1927_v9 = vadd.f32 %v1926_v41, %v1925_v4  ;;  %v1928_v11 = vpop.f32.mrb[34].mxu0 }
 0x33a   : > { %v1929_v12 = vpop.f32.mrb[35].mxu0 }
 0x33b   : > { %v1532_v10 = vadd.f32 %v1927_v9, %v2910_v8  ;;  %v1930_v13 = vadd.f32 %v1929_v12, %v1928_v11 }
 0x33d   : > { %1658 = vst [vmem:[%s2913_s17] sm:$0xff] %v1532_v10  ;;  %v1535_v15 = vadd.f32 %v1930_v13, %v2910_v8 }
 0x33f   : > { %1659 = vst [vmem:[%s2913_s17 + $0x8] sm:$0xff] %v1535_v15  ;;  %v1931_v16 = vpop.f32.mrb[36].mxu0 }
 0x340   : > { %v1932_v18 = vpop.f32.mrb[37].mxu0 }
 0x341   : > { %v1933_v19 = vadd.f32 %v1932_v18, %v1931_v16  ;;  %v1934_v21 = vpop.f32.mrb[38].mxu0 }
 0x342   : > { %v1935_v23 = vpop.f32.mrb[39].mxu0 }
 0x343   : > { %v1540_v24 = vadd.f32 %v1933_v19, %v2910_v8  ;;  %v1936_v26 = vadd.f32 %v1935_v23, %v1934_v21 }
 0x345   : > { %1660 = vst [vmem:[%s2913_s17 + $0x10] sm:$0xff] %v1540_v24  ;;  %v1543_v27 = vadd.f32 %v1936_v26, %v2910_v8 }
 0x347   : > { %1661 = vst [vmem:[%s2913_s17 + $0x18] sm:$0xff] %v1543_v27  ;;  %v1937_v28 = vpop.f32.mrb[40].mxu0 }
 0x348   : > { %v1938_v29 = vpop.f32.mrb[41].mxu0 }
 0x349   : > { %v1939_v30 = vadd.f32 %v1938_v29, %v1937_v28  ;;  %v1940_v31 = vpop.f32.mrb[42].mxu0 }
 0x34a   : > { %v1941_v32 = vpop.f32.mrb[43].mxu0 }
 0x34b   : > { %v1548_v33 = vadd.f32 %v1939_v30, %v2910_v8  ;;  %v1942_v6 = vadd.f32 %v1941_v32, %v1940_v31 }
 0x34d   : > { %1662 = vst [vmem:[%s2913_s17 + $0x20] sm:$0xff] %v1548_v33  ;;  %v1551_v7 = vadd.f32 %v1942_v6, %v2910_v8 }
 0x34f   : > { %1663 = vst [vmem:[%s2913_s17 + $0x28] sm:$0xff] %v1551_v7  ;;  %v1943_v37 = vpop.f32.mrb[44].mxu0 }
 0x350   : > { %v1944_v14 = vpop.f32.mrb[45].mxu0 }
 0x351   : > { %v1945_v44 = vadd.f32 %v1944_v14, %v1943_v37  ;;  %v1946_v48 = vpop.f32.mrb[46].mxu0 }
 0x352   : > { %v1947_v17 = vpop.f32.mrb[47].mxu0 }
 0x353   : > { %v1556_v20 = vadd.f32 %v1945_v44, %v2910_v8  ;;  %v1948_v49 = vadd.f32 %v1947_v17, %v1946_v48 }
 0x355   : > { %1664 = vst [vmem:[%s2913_s17 + $0x30] sm:$0xff] %v1556_v20  ;;  %v1559_v52 = vadd.f32 %v1948_v49, %v2910_v8 }
 0x357   : > { %1665 = vst [vmem:[%s2913_s17 + $0x38] sm:$0xff] %v1559_v52  ;;  %v1949_v22 = vpop.f32.mrb[48].mxu0 }
 0x358   : > { %v1950_v25 = vpop.f32.mrb[49].mxu0 }
 0x359   : > { %v1951_v34 = vadd.f32 %v1950_v25, %v1949_v22  ;;  %v1952_v0 = vpop.f32.mrb[50].mxu0 }
 0x35a   : > { %v1953_v35 = vpop.f32.mrb[51].mxu0 }
 0x35b   : > { %v1564_v36 = vadd.f32 %v1951_v34, %v2910_v8  ;;  %v1954_v3 = vadd.f32 %v1953_v35, %v1952_v0 }
 0x35d   : > { %1666 = vst [vmem:[%s2913_s17 + $0x40] sm:$0xff] %v1564_v36  ;;  %v1567_v5 = vadd.f32 %v1954_v3, %v2910_v8 }
 0x35f   : > { %1667 = vst [vmem:[%s2913_s17 + $0x48] sm:$0xff] %v1567_v5  ;;  %v1955_v38 = vpop.f32.mrb[52].mxu0 }
 0x360   : > { %v1956_v39 = vpop.f32.mrb[53].mxu0 }
 0x361   : > { %v1957_v40 = vadd.f32 %v1956_v39, %v1955_v38  ;;  %v1958_v42 = vpop.f32.mrb[54].mxu0 }
 0x362   : > { %v1959_v43 = vpop.f32.mrb[55].mxu0 }
 0x363   : > { %v1572_v45 = vadd.f32 %v1957_v40, %v2910_v8  ;;  %v1960_v46 = vadd.f32 %v1959_v43, %v1958_v42 }
 0x365   : > { %1668 = vst [vmem:[%s2913_s17 + $0x50] sm:$0xff] %v1572_v45  ;;  %v1575_v47 = vadd.f32 %v1960_v46, %v2910_v8 }
 0x367   : > { %1669 = vst [vmem:[%s2913_s17 + $0x58] sm:$0xff] %v1575_v47  ;;  %v1961_v50 = vpop.f32.mrb[56].mxu0 }
 0x368   : > { %v1962_v51 = vpop.f32.mrb[57].mxu0 }
 0x369   : > { %v1963_v53 = vadd.f32 %v1962_v51, %v1961_v50  ;;  %v1964_v54 = vpop.f32.mrb[58].mxu0 }
 0x36a   : > { %v1965_v55 = vpop.f32.mrb[59].mxu0 }
 0x36b   : > { %v1580_v56 = vadd.f32 %v1963_v53, %v2910_v8  ;;  %v1966_v57 = vadd.f32 %v1965_v55, %v1964_v54 }
 0x36d   : > { %1670 = vst [vmem:[%s2913_s17 + $0x60] sm:$0xff] %v1580_v56  ;;  %v1583_v58 = vadd.f32 %v1966_v57, %v2910_v8 }
 0x36f   : > { %1671 = vst [vmem:[%s2913_s17 + $0x68] sm:$0xff] %v1583_v58  ;;  %v1967_v59 = vpop.f32.mrb[60].mxu0 }
 0x370   : > { %v1968_v60 = vpop.f32.mrb[61].mxu0 }
 0x371   : > { %v1969_v61 = vadd.f32 %v1968_v60, %v1967_v59  ;;  %v1970_v62 = vpop.f32.mrb[62].mxu0 }
 0x372   : > { %v1971_v63 = vpop.f32.mrb[63].mxu0 }
 0x373   : > { %v1588_v1 = vadd.f32 %v1969_v61, %v2910_v8  ;;  %v1972_v2 = vadd.f32 %v1971_v63, %v1970_v62 }
 0x375   : > { %1672 = vst [vmem:[%s2913_s17 + $0x70] sm:$0xff] %v1588_v1  ;;  %v1591_v4 = vadd.f32 %v1972_v2, %v2910_v8 }
 0x377   : > { %1673 = vst [vmem:[%s2913_s17 + $0x78] sm:$0xff] %v1591_v4  ;;  %v1973_v41 = vpop.f32.mrb[64].mxu0 }
 0x378   : > { %v1974_v9 = vpop.f32.mrb[65].mxu0 }
 0x379   : > { %v1975_v11 = vadd.f32 %v1974_v9, %v1973_v41  ;;  %v1976_v12 = vpop.f32.mrb[66].mxu0 }
 0x37a   : > { %v1977_v10 = vpop.f32.mrb[67].mxu0 }
 0x37b   : > { %v1596_v13 = vadd.f32 %v1975_v11, %v2910_v8  ;;  %v1978_v15 = vadd.f32 %v1977_v10, %v1976_v12 }
 0x37d   : > { %1674 = vst [vmem:[%s2913_s17 + $0x80] sm:$0xff] %v1596_v13  ;;  %v1599_v16 = vadd.f32 %v1978_v15, %v2910_v8 }
 0x37f   : > { %1675 = vst [vmem:[%s2913_s17 + $0x88] sm:$0xff] %v1599_v16  ;;  %v1979_v18 = vpop.f32.mrb[68].mxu0 }
 0x380   : > { %v1980_v19 = vpop.f32.mrb[69].mxu0 }
 0x381   : > { %v1981_v21 = vadd.f32 %v1980_v19, %v1979_v18  ;;  %v1982_v23 = vpop.f32.mrb[70].mxu0 }
 0x382   : > { %v1983_v24 = vpop.f32.mrb[71].mxu0 }
 0x383   : > { %v1604_v26 = vadd.f32 %v1981_v21, %v2910_v8  ;;  %v1984_v27 = vadd.f32 %v1983_v24, %v1982_v23 }
 0x385   : > { %1676 = vst [vmem:[%s2913_s17 + $0x90] sm:$0xff] %v1604_v26  ;;  %v1607_v28 = vadd.f32 %v1984_v27, %v2910_v8 }
 0x387   : > { %1677 = vst [vmem:[%s2913_s17 + $0x98] sm:$0xff] %v1607_v28  ;;  %v1985_v29 = vpop.f32.mrb[72].mxu0 }
 0x388   : > { %v1986_v30 = vpop.f32.mrb[73].mxu0 }
 0x389   : > { %v1987_v31 = vadd.f32 %v1986_v30, %v1985_v29  ;;  %v1988_v32 = vpop.f32.mrb[74].mxu0 }
 0x38a   : > { %v1989_v33 = vpop.f32.mrb[75].mxu0 }
 0x38b   : > { %v1612_v6 = vadd.f32 %v1987_v31, %v2910_v8  ;;  %v1990_v7 = vadd.f32 %v1989_v33, %v1988_v32 }
 0x38d   : > { %1678 = vst [vmem:[%s2913_s17 + $0xa0] sm:$0xff] %v1612_v6  ;;  %v1615_v37 = vadd.f32 %v1990_v7, %v2910_v8 }
 0x38f   : > { %1679 = vst [vmem:[%s2913_s17 + $0xa8] sm:$0xff] %v1615_v37  ;;  %v1991_v14 = vpop.f32.mrb[76].mxu0 }
 0x390   : > { %v1992_v44 = vpop.f32.mrb[77].mxu0 }
 0x391   : > { %v1993_v48 = vadd.f32 %v1992_v44, %v1991_v14  ;;  %v1994_v17 = vpop.f32.mrb[78].mxu0 }
 0x392   : > { %v1995_v20 = vpop.f32.mrb[79].mxu0 }
 0x393   : > { %v1620_v49 = vadd.f32 %v1993_v48, %v2910_v8  ;;  %v1996_v52 = vadd.f32 %v1995_v20, %v1994_v17 }
 0x395   : > { %1680 = vst [vmem:[%s2913_s17 + $0xb0] sm:$0xff] %v1620_v49  ;;  %v1623_v22 = vadd.f32 %v1996_v52, %v2910_v8 }
 0x397   : > { %1681 = vst [vmem:[%s2913_s17 + $0xb8] sm:$0xff] %v1623_v22  ;;  %v1997_v25 = vpop.f32.mrb[80].mxu0 }
 0x398   : > { %v1998_v34 = vpop.f32.mrb[81].mxu0 }
 0x399   : > { %v1999_v0 = vadd.f32 %v1998_v34, %v1997_v25  ;;  %v2000_v35 = vpop.f32.mrb[82].mxu0 }
 0x39a   : > { %v2001_v36 = vpop.f32.mrb[83].mxu0 }
 0x39b   : > { %v1628_v3 = vadd.f32 %v1999_v0, %v2910_v8  ;;  %v2002_v5 = vadd.f32 %v2001_v36, %v2000_v35 }
 0x39d   : > { %1682 = vst [vmem:[%s2913_s17 + $0xc0] sm:$0xff] %v1628_v3  ;;  %v1631_v38 = vadd.f32 %v2002_v5, %v2910_v8 }
 0x39f   : > { %1683 = vst [vmem:[%s2913_s17 + $0xc8] sm:$0xff] %v1631_v38  ;;  %v2003_v39 = vpop.f32.mrb[84].mxu0 }
 0x3a0   : > { %v2004_v40 = vpop.f32.mrb[85].mxu0 }
 0x3a1   : > { %v2005_v42 = vadd.f32 %v2004_v40, %v2003_v39  ;;  %v2006_v43 = vpop.f32.mrb[86].mxu0 }
 0x3a2   : > { %v2007_v45 = vpop.f32.mrb[87].mxu0 }
 0x3a3   : > { %v1636_v46 = vadd.f32 %v2005_v42, %v2910_v8  ;;  %v2008_v47 = vadd.f32 %v2007_v45, %v2006_v43 }
 0x3a5   : > { %1684 = vst [vmem:[%s2913_s17 + $0xd0] sm:$0xff] %v1636_v46  ;;  %v1639_v50 = vadd.f32 %v2008_v47, %v2910_v8 }
 0x3a7   : > { %1685 = vst [vmem:[%s2913_s17 + $0xd8] sm:$0xff] %v1639_v50  ;;  %v2009_v51 = vpop.f32.mrb[88].mxu0 }
 0x3a8   : > { %v2010_v53 = vpop.f32.mrb[89].mxu0 }
 0x3a9   : > { %v2011_v54 = vadd.f32 %v2010_v53, %v2009_v51  ;;  %v2012_v55 = vpop.f32.mrb[90].mxu0 }
 0x3aa   : > { %v2013_v56 = vpop.f32.mrb[91].mxu0 }
 0x3ab   : > { %v1644_v57 = vadd.f32 %v2011_v54, %v2910_v8  ;;  %v2014_v58 = vadd.f32 %v2013_v56, %v2012_v55 }
 0x3ad   : > { %1686 = vst [vmem:[%s2913_s17 + $0xe0] sm:$0xff] %v1644_v57  ;;  %v1647_v59 = vadd.f32 %v2014_v58, %v2910_v8 }
 0x3af   : > { %1687 = vst [vmem:[%s2913_s17 + $0xe8] sm:$0xff] %v1647_v59  ;;  %v2015_v60 = vpop.f32.mrb[92].mxu0 }
 0x3b0   : > { %v2016_v61 = vpop.f32.mrb[93].mxu0 }
 0x3b1   : > { %v2017_v62 = vadd.f32 %v2016_v61, %v2015_v60  ;;  %v2018_v63 = vpop.f32.mrb[94].mxu0 }
 0x3b2   : > { %v2019_v1 = vpop.f32.mrb[95].mxu0 }
 0x3b3   : > { %v1652_v2 = vadd.f32 %v2017_v62, %v2910_v8  ;;  %v2020_v4 = vadd.f32 %v2019_v1, %v2018_v63 }
 0x3b5   : > { %1688 = vst [vmem:[%s2913_s17 + $0xf0] sm:$0xff] %v1652_v2  ;;  %v1655_v41 = vadd.f32 %v2020_v4, %v2910_v8 }
 0x3b7   : > { %1689 = vst [vmem:[%s2913_s17 + $0xf8] sm:$0xff] %v1655_v41 }
 0x3b8   : > { %2352 = shalt.err (!%p2349_p4)
}
 0x3b9   : > { %s2353_s22 = scalar_lea.hbm %s2980_s11, 4096  ;;  %s2357_s15 = scalar_lea.hbm %s3036_s7, 8192 }
 0x3ba   : > { %p2354_p9 = scmp.ne.s32.totalorder %s2980_s11, %s2353_s22  ;;  %p2358_p8 = scmp.lt.u32.totalorder %s2980_s11, %s3036_s7 }
 0x3bb   : > { %p2359_p13 = scmp.lt.u32.totalorder %s2357_s15, %s2353_s22  ;;  %p2361_p10 = scmp.lt.u32.totalorder %s2353_s22, %s2980_s11 }
 0x3bc   : > { %p2355_p0 = pnand %p2354_p9, %p2615_p5 }
 0x3bd   : > { %p2360_p6 = por %p2359_p13, %p2358_p8 }
 0x3be   : > { %p2356_p11 = pneg %p2355_p0 }
 0x3bf   : > { %p2362_p3 = por %p2361_p10, %p2360_p6 }
 0x3c1   : > { %p2363_p7 = pnand %p2362_p3, %p2356_p11 }
 0x3c3   : > { %2366 = shalt.err (!%p2363_p7)
}
 0x3c4   : > { %s2425_s29 = smov 128   ;;  %s2426_s23 = smov 8  }
 0x3c5   : > { %2051 = dma.vmem_to_hbm [thread:$0]  (%p2615_p5), %s2982_s16, 4096, %s2980_s11, %s1691_s28, %s2425_s29, %s2425_s29, %s2426_s23  }
 0x3c6 PF: > { %s3056_s20 = sld [smem:[#allocation15_spill]]  ;;  %s1719_s30 = sand.u32 1, %s2401_s24  }
 0x3c7   : > { %p3058_p2 = scmp.ge.s32.totalorder %s2413_s27, 2  ;;  %s1720_s9 = scalar_lea.sflag [#allocation4], %s1719_s30 }
 0x3cc   : > { %p3057_p12 = scmp.ne.s32.totalorder %s3056_s20, 0 }
 0x3ce   : > { %p2068_p1 = pnand %p3058_p2, %p3057_p12 }
 0x3d0   : > { %2396 = dma.done.wait (!%p2068_p1), %s1720_s9, 4096  }
 0x3d1   : > { %2398 = vsyncadd (!%p2068_p1), %s1720_s9, 4294963200  ;;  %p22_p4 = scmp.ge.s32.totalorder %s2601_s8, 4   ;;  %s3059_s24 = smov %s2405_s25 }
 0x3d2   : > { %s3060_s25 = smov %s2409_s26  ;;  %s3061_s26 = smov %s2611_s19 }
 0x3d3   : > { %s3062_s27 = smov %s2601_s8  ;;  %24 = sbr.rel (!%p22_p4) target bundleno = 7 (0x7), region = 105 }
 0x3da   :  { %1725 = vsyncpa [#allocation3], 1 }
 0x3db   :  { %1727 = vsyncpa [#allocation3 + $0x1], 1 }
 0x3dc   :  { %1728 = vsyncpa [#allocation6], 1 }
 0x3dd   :  { %1729 = vsyncpa [#allocation9], 1 }
 0x3de   :  { %1730 = vsyncpa [#allocation4], 1 }
 0x3df   :  { %1732 = vsyncpa [#allocation4 + $0x1], 1 }

</bundles_post_ra>
